<compile_context>
chip_gen: v7x
topology: tpu7x:2x2x1
jax: 0.10.0
libtpu: 0.0.40
codegen_flags: <defaults>
</compile_context>

<pallas_src>
import functools

import numpy as np
import jax
import jax.numpy as jnp
from jax.experimental import pallas as pl
from jax.experimental.pallas import tpu as pltpu


def _conv_bn_silu_kernel(x_ref, w_ref, b_ref, o_ref, acc_ref, *, k, s, apply_act, approx_silu):
    """One (batch, output-row-tile) grid step.

    x_ref:   (th_in, wp, c1)  compute-dtype input row slab (already spatially zero-padded)
    w_ref:   (k, k, c1, c2)   compute-dtype weights with BN scale folded in (resident)
    b_ref:   (1, c2)          f32 folded BN bias
    o_ref:   (th, w_out, c2)  output tile
    acc_ref: (th, w_out, c2)  f32 VMEM accumulator scratch
    """
    th, w_out, _ = o_ref.shape
    acc_ref[...] = jnp.zeros_like(acc_ref)

    # k*k taps: each is a (th*w_out, c1) x (c1, c2) MXU matmul accumulated in f32.
    # TODO(synk): fold the taps into a single im2col matmul (contraction k*k*c1) per tile,
    #             and add a space-to-depth path for low-channel (c1 < 32) stem layers.
    for kh in range(k):
        for kw in range(k):
            if s == 1:
                patch = x_ref[kh:kh + th, kw:kw + w_out, :]
            else:
                # stride > 1 handled with documented strided ref reads (not exercised in demo)
                patch = x_ref[pl.ds(kh, th, stride=s), pl.ds(kw, w_out, stride=s), :]
            acc_ref[...] += jnp.einsum(
                "hwc,cd->hwd", patch, w_ref[kh, kw],
                preferred_element_type=jnp.float32)

    y = acc_ref[...] + b_ref[...]                      # folded-BN bias (scale is in weights), f32
    if apply_act:
        if approx_silu:
            sig = pl.reciprocal(1.0 + jnp.exp(-y), approx=True)   # EUP exp + approx reciprocal
        else:
            sig = jax.nn.sigmoid(y)
        y = y * sig                                    # SiLU
    o_ref[...] = y.astype(o_ref.dtype)


def _choose_tile_rows(h_out, w_out, wp, c1, c2, k, s, in_isz, out_isz, budget_bytes):
    """Largest output-row tile whose double-buffered working set fits `budget_bytes`."""
    def working_set(th):
        th_in = (th - 1) * s + k
        in_tile = th_in * wp * c1 * in_isz            # input slab tile
        out_tile = th * w_out * c2 * out_isz          # output tile
        acc = th * w_out * c2 * 4                     # f32 accumulator scratch
        patch = th * w_out * c1 * in_isz              # per-tap patch temporary
        wts = k * k * c1 * c2 * in_isz                # resident weights
        return 2 * (in_tile + out_tile) + acc + patch + wts

    th = h_out
    while th > 1 and working_set(th) > budget_bytes:
        th = (th + 1) // 2
    return th


def conv_bn_silu(x_nchw, weight_oihw, gamma, beta, running_mean, running_var, *,
                 k=1, s=1, p=None, eps=1e-5, act=True,
                 compute_dtype=jnp.bfloat16, tile_rows=None, approx_silu=None,
                 vmem_budget_bytes=12 * 1024 * 1024):
    """Equivalent of Conv.forward(x): SiLU(BN(Conv2d(x))) with BatchNorm in eval mode."""
    if p is None:
        p = k // 2                                    # autopad
    n, c1, h, w = x_nchw.shape
    c2 = weight_oihw.shape[0]
    assert weight_oihw.shape == (c2, c1, k, k), "grouped conv (g > 1) not supported"
    h_out = (h + 2 * p - k) // s + 1
    w_out = (w + 2 * p - k) // s + 1
    out_dtype = x_nchw.dtype
    compute_dtype = np.dtype(compute_dtype)
    if approx_silu is None:
        approx_silu = compute_dtype != np.dtype(jnp.float32)

    # --- fold BatchNorm (eval): y = conv(x, w * scale) + (beta - mean * scale) ---
    scale = (gamma / jnp.sqrt(running_var + eps)).astype(jnp.float32)                 # (c2,)
    bias = (beta.astype(jnp.float32)
            - running_mean.astype(jnp.float32) * scale).reshape(1, c2)                # f32
    w_hwio = (jnp.transpose(weight_oihw, (2, 3, 1, 0)).astype(jnp.float32)
              * scale).astype(compute_dtype)                                          # (k,k,c1,c2)

    # --- layout: NCHW -> NHWC (channels on lanes), spatial zero-pad, compute dtype ---
    x_pad = jnp.pad(jnp.transpose(x_nchw, (0, 2, 3, 1)).astype(compute_dtype),
                    ((0, 0), (p, p), (p, p), (0, 0)))
    hp, wp = h + 2 * p, w + 2 * p

    # --- output-row tiling (bounds per-step VMEM; conservative budget fits every TPU gen) ---
    th = tile_rows if tile_rows is not None else _choose_tile_rows(
        h_out, w_out, wp, c1, c2, k, s, compute_dtype.itemsize,
        np.dtype(out_dtype).itemsize, vmem_budget_bytes)
    th = max(1, min(int(th), h_out))
    n_tiles = -(-h_out // th)
    h_out_pad = n_tiles * th
    th_in = (th - 1) * s + k
    rows_needed = (h_out_pad - 1) * s + k
    if rows_needed > hp:                              # last tile runs past the padded input
        x_pad = jnp.pad(x_pad, ((0, 0), (0, rows_needed - hp), (0, 0), (0, 0)))

    # Overlapping row slabs (k-1 halo rows duplicated once in HBM) so every grid step reads a
    # plain Blocked tile and the pipeline stays double-buffered.
    # TODO(synk): replace with element-offset input indexing (pl.Element) or manual DMA to
    #             avoid the wrapper-side halo-duplication pass.
    slabs = jnp.stack([x_pad[:, i * th * s:i * th * s + th_in] for i in range(n_tiles)],
                      axis=1)                                     # (n, n_tiles, th_in, wp, c1)
    slabs = slabs.reshape(n * n_tiles, th_in, wp, c1)

    kernel = functools.partial(_conv_bn_silu_kernel, k=k, s=s,
                               apply_act=bool(act), approx_silu=bool(approx_silu))

    out_flat = pl.pallas_call(
        kernel,
        out_shape=jax.ShapeDtypeStruct((n * n_tiles, th, w_out, c2), out_dtype),
        grid_spec=pltpu.PrefetchScalarGridSpec(
            num_scalar_prefetch=0,
            grid=(n, n_tiles),
            in_specs=[
                pl.BlockSpec((None, th_in, wp, c1),
                             lambda b, i: (b * n_tiles + i, 0, 0, 0)),
                pl.BlockSpec((k, k, c1, c2), lambda b, i: (0, 0, 0, 0)),   # resident weights
                pl.BlockSpec((1, c2), lambda b, i: (0, 0)),                # resident bias
            ],
            out_specs=pl.BlockSpec((None, th, w_out, c2),
                                   lambda b, i: (b * n_tiles + i, 0, 0, 0)),
            scratch_shapes=[pltpu.VMEM((th, w_out, c2), jnp.float32)],
        ),
        compiler_params=pltpu.CompilerParams(
            dimension_semantics=("parallel", "parallel"),   # megacore-shardable on v7x
            vmem_limit_bytes=32 * 1024 * 1024),
    )(slabs, w_hwio, bias)

    out_nhwc = out_flat.reshape(n, h_out_pad, w_out, c2)[:, :h_out]
    return jnp.transpose(out_nhwc, (0, 3, 1, 2))              # NHWC -> NCHW


def _reference(x, w, gamma, beta, mean, var, *, k, s, p, eps=1e-5):
    y = jax.lax.conv_general_dilated(
        x, w, window_strides=(s, s), padding=[(p, p), (p, p)],
        dimension_numbers=("NCHW", "OIHW", "NCHW"))
    scale = gamma / jnp.sqrt(var + eps)
    bias = beta - mean * scale
    y = y * scale[None, :, None, None] + bias[None, :, None, None]
    return y * jax.nn.sigmoid(y)


if __name__ == "__main__":
    N, C1, H, W, C2 = 2, 4, 16, 16, 8
    key = jax.random.PRNGKey(0)
    kx, kw3, kw1, kg, kb, km, kv = jax.random.split(key, 7)

    x = jax.random.normal(kx, (N, C1, H, W), dtype=jnp.float32)
    w3 = jax.random.normal(kw3, (C2, C1, 3, 3), dtype=jnp.float32) * 0.1     # Conv(k=3), bias=False
    w1 = jax.random.normal(kw1, (C2, C1, 1, 1), dtype=jnp.float32) * 0.1     # Conv(k=1) default
    gamma = 1.0 + 0.1 * jax.random.normal(kg, (C2,), dtype=jnp.float32)      # BN weight
    beta = 0.1 * jax.random.normal(kb, (C2,), dtype=jnp.float32)             # BN bias
    rmean = 0.1 * jax.random.normal(km, (C2,), dtype=jnp.float32)
    rvar = jnp.abs(1.0 + 0.1 * jax.random.normal(kv, (C2,), dtype=jnp.float32))

    ref3 = _reference(x, w3, gamma, beta, rmean, rvar, k=3, s=1, p=1)
    ref1 = _reference(x, w1, gamma, beta, rmean, rvar, k=1, s=1, p=0)

    # 1) k=3: f32 compute path, forced 2-way row tiling -- tight numerics check.
    out = conv_bn_silu(x, w3, gamma, beta, rmean, rvar, k=3, s=1,
                       compute_dtype=jnp.float32, tile_rows=8)
    out = jax.block_until_ready(out)
    assert out.shape == (N, C2, H, W)
    assert jnp.allclose(out, ref3, atol=1e-4, rtol=1e-4), \
        float(jnp.max(jnp.abs(out - ref3)))

    # 2) k=3: bf16 compute path, non-dividing row tile (exercises edge-row padding).
    out_bf16 = conv_bn_silu(x, w3, gamma, beta, rmean, rvar, k=3, s=1,
                            compute_dtype=jnp.bfloat16, tile_rows=5)
    out_bf16 = jax.block_until_ready(out_bf16)
    assert out_bf16.shape == (N, C2, H, W)
    assert jnp.allclose(out_bf16, ref3, atol=2e-2, rtol=2e-2), \
        float(jnp.max(jnp.abs(out_bf16 - ref3)))

    # 3) k=1 (the Conv default): bf16 compute path, auto tile size.
    out_1x1 = conv_bn_silu(x, w1, gamma, beta, rmean, rvar, k=1, s=1,
                           compute_dtype=jnp.bfloat16)
    out_1x1 = jax.block_until_ready(out_1x1)
    assert out_1x1.shape == (N, C2, H, W)
    assert jnp.allclose(out_1x1, ref1, atol=2e-2, rtol=2e-2), \
        float(jnp.max(jnp.abs(out_1x1 - ref1)))

    print("KERNEL_OK")
</pallas_src>

<mosaic_0001>
module attributes {stable_mosaic.version = 11 : i64} {
  func.func @_conv_bn_silu_kernel(%arg0: i32, %arg1: i32, %arg2: memref<1x10x18x4xf32, #tpu.memory_space<vmem>>, %arg3: memref<3x3x4x8xf32, #tpu.memory_space<vmem>>, %arg4: memref<1x8xf32, #tpu.memory_space<vmem>>, %arg5: memref<1x8x16x8xf32, #tpu.memory_space<vmem>>, %arg6: memref<8x16x8xf32, #tpu.memory_space<vmem>>) attributes {dimension_semantics = [#tpu.dimension_semantics<parallel>, #tpu.dimension_semantics<parallel>], iteration_bounds = array<i64: 2, 2>, scalar_prefetch = 0 : i64, scratch_operands = 1 : i64, tpu.core_type = #tpu.core_type<tc>, window_params = [{transform_indices = @transform_0, window_bounds = array<i64: 1, 10, 18, 4>}, {pipeline_mode = #tpu.pipeline_mode<synchronous>, transform_indices = @transform_1, window_bounds = array<i64: 3, 3, 4, 8>}, {pipeline_mode = #tpu.pipeline_mode<synchronous>, transform_indices = @transform_2, window_bounds = array<i64: 1, 8>}, {transform_indices = @transform_3, window_bounds = array<i64: 1, 8, 16, 8>}]} {
    %cst = arith.constant 0.000000e+00 : f32
    %0 = vector.broadcast %cst : f32 to vector<8x16x8xf32>
    %c0 = arith.constant 0 : index
    %c0_0 = arith.constant 0 : index
    %c0_1 = arith.constant 0 : index
    %1 = vector.load %arg6[%c0, %c0_0, %c0_1] : memref<8x16x8xf32, #tpu.memory_space<vmem>>, vector<8x16x8xf32>
    tpu.vector_store %arg6[%c0, %c0_0, %c0_1], %0 {strides = array<i32>} : memref<8x16x8xf32, #tpu.memory_space<vmem>>, vector<8x16x8xf32>,
    %c0_2 = arith.constant 0 : index
    %c0_3 = arith.constant 0 : index
    %c0_4 = arith.constant 0 : index
    %c0_5 = arith.constant 0 : index
    %2 = vector.load %arg2[%c0_2, %c0_3, %c0_4, %c0_5] : memref<1x10x18x4xf32, #tpu.memory_space<vmem>>, vector<1x8x16x4xf32>
    %3 = vector.shape_cast %2 : vector<1x8x16x4xf32> to vector<8x16x4xf32>
    %c0_6 = arith.constant 0 : index
    %c0_7 = arith.constant 0 : index
    %c0_8 = arith.constant 0 : index
    %4 = vector.load %arg6[%c0_6, %c0_7, %c0_8] : memref<8x16x8xf32, #tpu.memory_space<vmem>>, vector<8x16x8xf32>
    %c0_9 = arith.constant 0 : index
    %c0_10 = arith.constant 0 : index
    %c0_11 = arith.constant 0 : index
    %c0_12 = arith.constant 0 : index
    %5 = vector.load %arg3[%c0_9, %c0_10, %c0_11, %c0_12] : memref<3x3x4x8xf32, #tpu.memory_space<vmem>>, vector<1x1x4x8xf32>
    %6 = vector.shape_cast %5 : vector<1x1x4x8xf32> to vector<4x8xf32>
    "tpu.trace_start"() <{level = 10 : i32, message = "hwc,cd->hwd"}> : () -> ()
    %cst_13 = arith.constant dense<0.000000e+00> : vector<8x16x8xf32>
    %7 = tpu.matmul %3, %6, %cst_13 {dimension_numbers = #tpu.dot_dimension_numbers<[2], [0], [0, 1], [1], [0, 0, 0, 1, 1, 1], [], []>} : vector<8x16x4xf32>, vector<4x8xf32>, vector<8x16x8xf32> -> vector<8x16x8xf32>
    "tpu.trace_stop"() : () -> ()
    %8 = arith.addf %4, %7 : vector<8x16x8xf32>
    %c0_14 = arith.constant 0 : index
    %c0_15 = arith.constant 0 : index
    %c0_16 = arith.constant 0 : index
    %9 = vector.load %arg6[%c0_14, %c0_15, %c0_16] : memref<8x16x8xf32, #tpu.memory_space<vmem>>, vector<8x16x8xf32>
    tpu.vector_store %arg6[%c0_14, %c0_15, %c0_16], %8 {strides = array<i32>} : memref<8x16x8xf32, #tpu.memory_space<vmem>>, vector<8x16x8xf32>,
    %c0_17 = arith.constant 0 : index
    %c0_18 = arith.constant 0 : index
    %c1 = arith.constant 1 : index
    %c0_19 = arith.constant 0 : index
    %10 = vector.load %arg2[%c0_17, %c0_18, %c1, %c0_19] : memref<1x10x18x4xf32, #tpu.memory_space<vmem>>, vector<1x8x16x4xf32>
    %11 = vector.shape_cast %10 : vector<1x8x16x4xf32> to vector<8x16x4xf32>
    %c0_20 = arith.constant 0 : index
    %c0_21 = arith.constant 0 : index
    %c0_22 = arith.constant 0 : index
    %12 = vector.load %arg6[%c0_20, %c0_21, %c0_22] : memref<8x16x8xf32, #tpu.memory_space<vmem>>, vector<8x16x8xf32>
    %c0_23 = arith.constant 0 : index
    %c1_24 = arith.constant 1 : index
    %c0_25 = arith.constant 0 : index
    %c0_26 = arith.constant 0 : index
    %13 = vector.load %arg3[%c0_23, %c1_24, %c0_25, %c0_26] : memref<3x3x4x8xf32, #tpu.memory_space<vmem>>, vector<1x1x4x8xf32>
    %14 = vector.shape_cast %13 : vector<1x1x4x8xf32> to vector<4x8xf32>
    "tpu.trace_start"() <{level = 10 : i32, message = "hwc,cd->hwd"}> : () -> ()
    %cst_27 = arith.constant dense<0.000000e+00> : vector<8x16x8xf32>
    %15 = tpu.matmul %11, %14, %cst_27 {dimension_numbers = #tpu.dot_dimension_numbers<[2], [0], [0, 1], [1], [0, 0, 0, 1, 1, 1], [], []>} : vector<8x16x4xf32>, vector<4x8xf32>, vector<8x16x8xf32> -> vector<8x16x8xf32>
    "tpu.trace_stop"() : () -> ()
    %16 = arith.addf %12, %15 : vector<8x16x8xf32>
    %c0_28 = arith.constant 0 : index
    %c0_29 = arith.constant 0 : index
    %c0_30 = arith.constant 0 : index
    %17 = vector.load %arg6[%c0_28, %c0_29, %c0_30] : memref<8x16x8xf32, #tpu.memory_space<vmem>>, vector<8x16x8xf32>
    tpu.vector_store %arg6[%c0_28, %c0_29, %c0_30], %16 {strides = array<i32>} : memref<8x16x8xf32, #tpu.memory_space<vmem>>, vector<8x16x8xf32>,
    %c0_31 = arith.constant 0 : index
    %c0_32 = arith.constant 0 : index
    %c2 = arith.constant 2 : index
    %c0_33 = arith.constant 0 : index
    %18 = vector.load %arg2[%c0_31, %c0_32, %c2, %c0_33] : memref<1x10x18x4xf32, #tpu.memory_space<vmem>>, vector<1x8x16x4xf32>
    %19 = vector.shape_cast %18 : vector<1x8x16x4xf32> to vector<8x16x4xf32>
    %c0_34 = arith.constant 0 : index
    %c0_35 = arith.constant 0 : index
    %c0_36 = arith.constant 0 : index
    %20 = vector.load %arg6[%c0_34, %c0_35, %c0_36] : memref<8x16x8xf32, #tpu.memory_space<vmem>>, vector<8x16x8xf32>
    %c0_37 = arith.constant 0 : index
    %c2_38 = arith.constant 2 : index
    %c0_39 = arith.constant 0 : index
    %c0_40 = arith.constant 0 : index
    %21 = vector.load %arg3[%c0_37, %c2_38, %c0_39, %c0_40] : memref<3x3x4x8xf32, #tpu.memory_space<vmem>>, vector<1x1x4x8xf32>
    %22 = vector.shape_cast %21 : vector<1x1x4x8xf32> to vector<4x8xf32>
    "tpu.trace_start"() <{level = 10 : i32, message = "hwc,cd->hwd"}> : () -> ()
    %cst_41 = arith.constant dense<0.000000e+00> : vector<8x16x8xf32>
    %23 = tpu.matmul %19, %22, %cst_41 {dimension_numbers = #tpu.dot_dimension_numbers<[2], [0], [0, 1], [1], [0, 0, 0, 1, 1, 1], [], []>} : vector<8x16x4xf32>, vector<4x8xf32>, vector<8x16x8xf32> -> vector<8x16x8xf32>
    "tpu.trace_stop"() : () -> ()
    %24 = arith.addf %20, %23 : vector<8x16x8xf32>
    %c0_42 = arith.constant 0 : index
    %c0_43 = arith.constant 0 : index
    %c0_44 = arith.constant 0 : index
    %25 = vector.load %arg6[%c0_42, %c0_43, %c0_44] : memref<8x16x8xf32, #tpu.memory_space<vmem>>, vector<8x16x8xf32>
    tpu.vector_store %arg6[%c0_42, %c0_43, %c0_44], %24 {strides = array<i32>} : memref<8x16x8xf32, #tpu.memory_space<vmem>>, vector<8x16x8xf32>,
    %c0_45 = arith.constant 0 : index
    %c1_46 = arith.constant 1 : index
    %c0_47 = arith.constant 0 : index
    %c0_48 = arith.constant 0 : index
    %26 = vector.load %arg2[%c0_45, %c1_46, %c0_47, %c0_48] : memref<1x10x18x4xf32, #tpu.memory_space<vmem>>, vector<1x8x16x4xf32>
    %27 = vector.shape_cast %26 : vector<1x8x16x4xf32> to vector<8x16x4xf32>
    %c0_49 = arith.constant 0 : index
    %c0_50 = arith.constant 0 : index
    %c0_51 = arith.constant 0 : index
    %28 = vector.load %arg6[%c0_49, %c0_50, %c0_51] : memref<8x16x8xf32, #tpu.memory_space<vmem>>, vector<8x16x8xf32>
    %c1_52 = arith.constant 1 : index
    %c0_53 = arith.constant 0 : index
    %c0_54 = arith.constant 0 : index
    %c0_55 = arith.constant 0 : index
    %29 = vector.load %arg3[%c1_52, %c0_53, %c0_54, %c0_55] : memref<3x3x4x8xf32, #tpu.memory_space<vmem>>, vector<1x1x4x8xf32>
    %30 = vector.shape_cast %29 : vector<1x1x4x8xf32> to vector<4x8xf32>
    "tpu.trace_start"() <{level = 10 : i32, message = "hwc,cd->hwd"}> : () -> ()
    %cst_56 = arith.constant dense<0.000000e+00> : vector<8x16x8xf32>
    %31 = tpu.matmul %27, %30, %cst_56 {dimension_numbers = #tpu.dot_dimension_numbers<[2], [0], [0, 1], [1], [0, 0, 0, 1, 1, 1], [], []>} : vector<8x16x4xf32>, vector<4x8xf32>, vector<8x16x8xf32> -> vector<8x16x8xf32>
    "tpu.trace_stop"() : () -> ()
    %32 = arith.addf %28, %31 : vector<8x16x8xf32>
    %c0_57 = arith.constant 0 : index
    %c0_58 = arith.constant 0 : index
    %c0_59 = arith.constant 0 : index
    %33 = vector.load %arg6[%c0_57, %c0_58, %c0_59] : memref<8x16x8xf32, #tpu.memory_space<vmem>>, vector<8x16x8xf32>
    tpu.vector_store %arg6[%c0_57, %c0_58, %c0_59], %32 {strides = array<i32>} : memref<8x16x8xf32, #tpu.memory_space<vmem>>, vector<8x16x8xf32>,
    %c0_60 = arith.constant 0 : index
    %c1_61 = arith.constant 1 : index
    %c1_62 = arith.constant 1 : index
    %c0_63 = arith.constant 0 : index
    %34 = vector.load %arg2[%c0_60, %c1_61, %c1_62, %c0_63] : memref<1x10x18x4xf32, #tpu.memory_space<vmem>>, vector<1x8x16x4xf32>
    %35 = vector.shape_cast %34 : vector<1x8x16x4xf32> to vector<8x16x4xf32>
    %c0_64 = arith.constant 0 : index
    %c0_65 = arith.constant 0 : index
    %c0_66 = arith.constant 0 : index
    %36 = vector.load %arg6[%c0_64, %c0_65, %c0_66] : memref<8x16x8xf32, #tpu.memory_space<vmem>>, vector<8x16x8xf32>
    %c1_67 = arith.constant 1 : index
    %c1_68 = arith.constant 1 : index
    %c0_69 = arith.constant 0 : index
    %c0_70 = arith.constant 0 : index
    %37 = vector.load %arg3[%c1_67, %c1_68, %c0_69, %c0_70] : memref<3x3x4x8xf32, #tpu.memory_space<vmem>>, vector<1x1x4x8xf32>
    %38 = vector.shape_cast %37 : vector<1x1x4x8xf32> to vector<4x8xf32>
    "tpu.trace_start"() <{level = 10 : i32, message = "hwc,cd->hwd"}> : () -> ()
    %cst_71 = arith.constant dense<0.000000e+00> : vector<8x16x8xf32>
    %39 = tpu.matmul %35, %38, %cst_71 {dimension_numbers = #tpu.dot_dimension_numbers<[2], [0], [0, 1], [1], [0, 0, 0, 1, 1, 1], [], []>} : vector<8x16x4xf32>, vector<4x8xf32>, vector<8x16x8xf32> -> vector<8x16x8xf32>
    "tpu.trace_stop"() : () -> ()
    %40 = arith.addf %36, %39 : vector<8x16x8xf32>
    %c0_72 = arith.constant 0 : index
    %c0_73 = arith.constant 0 : index
    %c0_74 = arith.constant 0 : index
    %41 = vector.load %arg6[%c0_72, %c0_73, %c0_74] : memref<8x16x8xf32, #tpu.memory_space<vmem>>, vector<8x16x8xf32>
    tpu.vector_store %arg6[%c0_72, %c0_73, %c0_74], %40 {strides = array<i32>} : memref<8x16x8xf32, #tpu.memory_space<vmem>>, vector<8x16x8xf32>,
    %c0_75 = arith.constant 0 : index
    %c1_76 = arith.constant 1 : index
    %c2_77 = arith.constant 2 : index
    %c0_78 = arith.constant 0 : index
    %42 = vector.load %arg2[%c0_75, %c1_76, %c2_77, %c0_78] : memref<1x10x18x4xf32, #tpu.memory_space<vmem>>, vector<1x8x16x4xf32>
    %43 = vector.shape_cast %42 : vector<1x8x16x4xf32> to vector<8x16x4xf32>
    %c0_79 = arith.constant 0 : index
    %c0_80 = arith.constant 0 : index
    %c0_81 = arith.constant 0 : index
    %44 = vector.load %arg6[%c0_79, %c0_80, %c0_81] : memref<8x16x8xf32, #tpu.memory_space<vmem>>, vector<8x16x8xf32>
    %c1_82 = arith.constant 1 : index
    %c2_83 = arith.constant 2 : index
    %c0_84 = arith.constant 0 : index
    %c0_85 = arith.constant 0 : index
    %45 = vector.load %arg3[%c1_82, %c2_83, %c0_84, %c0_85] : memref<3x3x4x8xf32, #tpu.memory_space<vmem>>, vector<1x1x4x8xf32>
    %46 = vector.shape_cast %45 : vector<1x1x4x8xf32> to vector<4x8xf32>
    "tpu.trace_start"() <{level = 10 : i32, message = "hwc,cd->hwd"}> : () -> ()
    %cst_86 = arith.constant dense<0.000000e+00> : vector<8x16x8xf32>
    %47 = tpu.matmul %43, %46, %cst_86 {dimension_numbers = #tpu.dot_dimension_numbers<[2], [0], [0, 1], [1], [0, 0, 0, 1, 1, 1], [], []>} : vector<8x16x4xf32>, vector<4x8xf32>, vector<8x16x8xf32> -> vector<8x16x8xf32>
    "tpu.trace_stop"() : () -> ()
    %48 = arith.addf %44, %47 : vector<8x16x8xf32>
    %c0_87 = arith.constant 0 : index
    %c0_88 = arith.constant 0 : index
    %c0_89 = arith.constant 0 : index
    %49 = vector.load %arg6[%c0_87, %c0_88, %c0_89] : memref<8x16x8xf32, #tpu.memory_space<vmem>>, vector<8x16x8xf32>
    tpu.vector_store %arg6[%c0_87, %c0_88, %c0_89], %48 {strides = array<i32>} : memref<8x16x8xf32, #tpu.memory_space<vmem>>, vector<8x16x8xf32>,
    %c0_90 = arith.constant 0 : index
    %c2_91 = arith.constant 2 : index
    %c0_92 = arith.constant 0 : index
    %c0_93 = arith.constant 0 : index
    %50 = vector.load %arg2[%c0_90, %c2_91, %c0_92, %c0_93] : memref<1x10x18x4xf32, #tpu.memory_space<vmem>>, vector<1x8x16x4xf32>
    %51 = vector.shape_cast %50 : vector<1x8x16x4xf32> to vector<8x16x4xf32>
    %c0_94 = arith.constant 0 : index
    %c0_95 = arith.constant 0 : index
    %c0_96 = arith.constant 0 : index
    %52 = vector.load %arg6[%c0_94, %c0_95, %c0_96] : memref<8x16x8xf32, #tpu.memory_space<vmem>>, vector<8x16x8xf32>
    %c2_97 = arith.constant 2 : index
    %c0_98 = arith.constant 0 : index
    %c0_99 = arith.constant 0 : index
    %c0_100 = arith.constant 0 : index
    %53 = vector.load %arg3[%c2_97, %c0_98, %c0_99, %c0_100] : memref<3x3x4x8xf32, #tpu.memory_space<vmem>>, vector<1x1x4x8xf32>
    %54 = vector.shape_cast %53 : vector<1x1x4x8xf32> to vector<4x8xf32>
    "tpu.trace_start"() <{level = 10 : i32, message = "hwc,cd->hwd"}> : () -> ()
    %cst_101 = arith.constant dense<0.000000e+00> : vector<8x16x8xf32>
    %55 = tpu.matmul %51, %54, %cst_101 {dimension_numbers = #tpu.dot_dimension_numbers<[2], [0], [0, 1], [1], [0, 0, 0, 1, 1, 1], [], []>} : vector<8x16x4xf32>, vector<4x8xf32>, vector<8x16x8xf32> -> vector<8x16x8xf32>
    "tpu.trace_stop"() : () -> ()
    %56 = arith.addf %52, %55 : vector<8x16x8xf32>
    %c0_102 = arith.constant 0 : index
    %c0_103 = arith.constant 0 : index
    %c0_104 = arith.constant 0 : index
    %57 = vector.load %arg6[%c0_102, %c0_103, %c0_104] : memref<8x16x8xf32, #tpu.memory_space<vmem>>, vector<8x16x8xf32>
    tpu.vector_store %arg6[%c0_102, %c0_103, %c0_104], %56 {strides = array<i32>} : memref<8x16x8xf32, #tpu.memory_space<vmem>>, vector<8x16x8xf32>,
    %c0_105 = arith.constant 0 : index
    %c2_106 = arith.constant 2 : index
    %c1_107 = arith.constant 1 : index
    %c0_108 = arith.constant 0 : index
    %58 = vector.load %arg2[%c0_105, %c2_106, %c1_107, %c0_108] : memref<1x10x18x4xf32, #tpu.memory_space<vmem>>, vector<1x8x16x4xf32>
    %59 = vector.shape_cast %58 : vector<1x8x16x4xf32> to vector<8x16x4xf32>
    %c0_109 = arith.constant 0 : index
    %c0_110 = arith.constant 0 : index
    %c0_111 = arith.constant 0 : index
    %60 = vector.load %arg6[%c0_109, %c0_110, %c0_111] : memref<8x16x8xf32, #tpu.memory_space<vmem>>, vector<8x16x8xf32>
    %c2_112 = arith.constant 2 : index
    %c1_113 = arith.constant 1 : index
    %c0_114 = arith.constant 0 : index
    %c0_115 = arith.constant 0 : index
    %61 = vector.load %arg3[%c2_112, %c1_113, %c0_114, %c0_115] : memref<3x3x4x8xf32, #tpu.memory_space<vmem>>, vector<1x1x4x8xf32>
    %62 = vector.shape_cast %61 : vector<1x1x4x8xf32> to vector<4x8xf32>
    "tpu.trace_start"() <{level = 10 : i32, message = "hwc,cd->hwd"}> : () -> ()
    %cst_116 = arith.constant dense<0.000000e+00> : vector<8x16x8xf32>
    %63 = tpu.matmul %59, %62, %cst_116 {dimension_numbers = #tpu.dot_dimension_numbers<[2], [0], [0, 1], [1], [0, 0, 0, 1, 1, 1], [], []>} : vector<8x16x4xf32>, vector<4x8xf32>, vector<8x16x8xf32> -> vector<8x16x8xf32>
    "tpu.trace_stop"() : () -> ()
    %64 = arith.addf %60, %63 : vector<8x16x8xf32>
    %c0_117 = arith.constant 0 : index
    %c0_118 = arith.constant 0 : index
    %c0_119 = arith.constant 0 : index
    %65 = vector.load %arg6[%c0_117, %c0_118, %c0_119] : memref<8x16x8xf32, #tpu.memory_space<vmem>>, vector<8x16x8xf32>
    tpu.vector_store %arg6[%c0_117, %c0_118, %c0_119], %64 {strides = array<i32>} : memref<8x16x8xf32, #tpu.memory_space<vmem>>, vector<8x16x8xf32>,
    %c0_120 = arith.constant 0 : index
    %c2_121 = arith.constant 2 : index
    %c2_122 = arith.constant 2 : index
    %c0_123 = arith.constant 0 : index
    %66 = vector.load %arg2[%c0_120, %c2_121, %c2_122, %c0_123] : memref<1x10x18x4xf32, #tpu.memory_space<vmem>>, vector<1x8x16x4xf32>
    %67 = vector.shape_cast %66 : vector<1x8x16x4xf32> to vector<8x16x4xf32>
    %c0_124 = arith.constant 0 : index
    %c0_125 = arith.constant 0 : index
    %c0_126 = arith.constant 0 : index
    %68 = vector.load %arg6[%c0_124, %c0_125, %c0_126] : memref<8x16x8xf32, #tpu.memory_space<vmem>>, vector<8x16x8xf32>
    %c2_127 = arith.constant 2 : index
    %c2_128 = arith.constant 2 : index
    %c0_129 = arith.constant 0 : index
    %c0_130 = arith.constant 0 : index
    %69 = vector.load %arg3[%c2_127, %c2_128, %c0_129, %c0_130] : memref<3x3x4x8xf32, #tpu.memory_space<vmem>>, vector<1x1x4x8xf32>
    %70 = vector.shape_cast %69 : vector<1x1x4x8xf32> to vector<4x8xf32>
    "tpu.trace_start"() <{level = 10 : i32, message = "hwc,cd->hwd"}> : () -> ()
    %cst_131 = arith.constant dense<0.000000e+00> : vector<8x16x8xf32>
    %71 = tpu.matmul %67, %70, %cst_131 {dimension_numbers = #tpu.dot_dimension_numbers<[2], [0], [0, 1], [1], [0, 0, 0, 1, 1, 1], [], []>} : vector<8x16x4xf32>, vector<4x8xf32>, vector<8x16x8xf32> -> vector<8x16x8xf32>
    "tpu.trace_stop"() : () -> ()
    %72 = arith.addf %68, %71 : vector<8x16x8xf32>
    %c0_132 = arith.constant 0 : index
    %c0_133 = arith.constant 0 : index
    %c0_134 = arith.constant 0 : index
    %73 = vector.load %arg6[%c0_132, %c0_133, %c0_134] : memref<8x16x8xf32, #tpu.memory_space<vmem>>, vector<8x16x8xf32>
    tpu.vector_store %arg6[%c0_132, %c0_133, %c0_134], %72 {strides = array<i32>} : memref<8x16x8xf32, #tpu.memory_space<vmem>>, vector<8x16x8xf32>,
    %c0_135 = arith.constant 0 : index
    %c0_136 = arith.constant 0 : index
    %c0_137 = arith.constant 0 : index
    %74 = vector.load %arg6[%c0_135, %c0_136, %c0_137] : memref<8x16x8xf32, #tpu.memory_space<vmem>>, vector<8x16x8xf32>
    %c0_138 = arith.constant 0 : index
    %c0_139 = arith.constant 0 : index
    %75 = vector.load %arg4[%c0_138, %c0_139] : memref<1x8xf32, #tpu.memory_space<vmem>>, vector<1x8xf32>
    %76 = vector.shape_cast %75 : vector<1x8xf32> to vector<1x1x8xf32>
    %77 = vector.broadcast %76 : vector<1x1x8xf32> to vector<8x16x8xf32>
    %78 = arith.addf %74, %77 : vector<8x16x8xf32>
    %79 = arith.negf %78 : vector<8x16x8xf32>
    %80 = math.exp %79 : vector<8x16x8xf32>
    %cst_140 = arith.constant 1.000000e+00 : f32
    %81 = vector.broadcast %cst_140 : f32 to vector<8x16x8xf32>
    %82 = arith.addf %81, %80 : vector<8x16x8xf32>
    %83 = arith.divf %81, %82 : vector<8x16x8xf32>
    %84 = arith.mulf %78, %83 : vector<8x16x8xf32>
    %c0_141 = arith.constant 0 : index
    %c0_142 = arith.constant 0 : index
    %c0_143 = arith.constant 0 : index
    %c0_144 = arith.constant 0 : index
    %85 = vector.load %arg5[%c0_141, %c0_142, %c0_143, %c0_144] : memref<1x8x16x8xf32, #tpu.memory_space<vmem>>, vector<1x8x16x8xf32>
    %86 = vector.shape_cast %85 : vector<1x8x16x8xf32> to vector<8x16x8xf32>
    %87 = vector.shape_cast %84 : vector<8x16x8xf32> to vector<1x8x16x8xf32>
    tpu.vector_store %arg5[%c0_141, %c0_142, %c0_143, %c0_144], %87 {strides = array<i32>} : memref<1x8x16x8xf32, #tpu.memory_space<vmem>>, vector<1x8x16x8xf32>,
    return
  }
  func.func @transform_0(%arg0: i32, %arg1: i32) -> (i32, i32, i32, i32) {
    %c2_i32 = arith.constant 2 : i32
    %0 = arith.muli %arg0, %c2_i32 : i32
    %1 = arith.addi %0, %arg1 : i32
    %c0_i32 = arith.constant 0 : i32
    %c0_i32_0 = arith.constant 0 : i32
    %c0_i32_1 = arith.constant 0 : i32
    %c0_i32_2 = arith.constant 0 : i32
    return %1, %c0_i32, %c0_i32_0, %c0_i32_1 : i32, i32, i32, i32
  }
  func.func @transform_1(%arg0: i32, %arg1: i32) -> (i32, i32, i32, i32) {
    %c0_i32 = arith.constant 0 : i32
    %c0_i32_0 = arith.constant 0 : i32
    %c0_i32_1 = arith.constant 0 : i32
    %c0_i32_2 = arith.constant 0 : i32
    %c0_i32_3 = arith.constant 0 : i32
    return %c0_i32, %c0_i32_0, %c0_i32_1, %c0_i32_2 : i32, i32, i32, i32
  }
  func.func @transform_2(%arg0: i32, %arg1: i32) -> (i32, i32) {
    %c0_i32 = arith.constant 0 : i32
    %c0_i32_0 = arith.constant 0 : i32
    %c0_i32_1 = arith.constant 0 : i32
    return %c0_i32, %c0_i32_0 : i32, i32
  }
  func.func @transform_3(%arg0: i32, %arg1: i32) -> (i32, i32, i32, i32) {
    %c2_i32 = arith.constant 2 : i32
    %0 = arith.muli %arg0, %c2_i32 : i32
    %1 = arith.addi %0, %arg1 : i32
    %c0_i32 = arith.constant 0 : i32
    %c0_i32_0 = arith.constant 0 : i32
    %c0_i32_1 = arith.constant 0 : i32
    %c0_i32_2 = arith.constant 0 : i32
    return %1, %c0_i32, %c0_i32_0, %c0_i32_1 : i32, i32, i32, i32
  }
}

</mosaic_0001>

<bundles_post_ra>
// kernel: tpu_custom_call.1
= control target key start
LH: loop header
LB: loop body
LE: loop exit
PB: predicated region body
PF: predicated region fallthrough
CT: control target
= control target key end

     0   :  { %s3672_s12 = smov 0   ;;  %s3674_s13 = smov 0   ;;  %s4479_s0 = inlined_call_operand.vmem [shape: f32[4,10,18,4], index: 0, kind: input, shape index: {}]   ;;  %s4480_s1 = inlined_call_operand.vmem [shape: f32[3,3,4,8], index: 1, kind: input, shape index: {}]   ;;  %s4481_s2 = inlined_call_operand.vmem [shape: f32[1,8], index: 2, kind: input, shape index: {}]   ;;  %s4482_s3 = inlined_call_operand.vmem [shape: f32[4,8,16,8], index: 3, kind: output, shape index: {}]  }
   0x1   :  { %s3676_s14 = smov 0   ;;  %s3678_s15 = smov 0  }
   0x2   :  { %s3680_s16 = smov 0  }
   0x3 LB: > { %s22_s17 = sadd.s32 1, %s3641_s14  ;;  %s25_s18 = sadd.s32 1, %s3645_s15  ;;  %s3649_s16 = sphi %s3680_s16, %s13_s16   ;;  %s3645_s15 = sphi %s3678_s15, %s4486_s15   ;;  %s3641_s14 = sphi %s3676_s14, %s4485_s14   ;;  %s3637_s13 = sphi %s3674_s13, %s4484_s13   ;;  %s3633_s12 = sphi %s3672_s12, %s4483_s12  }
   0x4   : > { %p23_p0 = scmp.ge.s32.totalorder %s22_s17, 2  ;;  %p2833_p1 = scmp.ge.s32.totalorder %s3649_s16, 1 }
   0x5   : > { %p161_p2 = scmp.lt.s32.totalorder %s3649_s16, 5 }
   0x6   : > { %s4488_s17 = smov (%p23_p0, %s22_s17), 0  ;;  %s4490_s18 = smov (!%p23_p0, %s25_s18), %s3645_s15 }
   0x7   : > { %p162_p3 = pnand %p2833_p1, %p161_p2  ;;  %p27_p4 = scmp.ge.s32.totalorder %s4490_s18, 2 }
   0x8   : > { %v256_v0 = vld [vmem:[%s4480_s1] sm:$0xf] (!%p162_p3)  ;;  %vm306_vm0 = vcmask (!%p162_p3), 1043456   ;;  %s2834_s21 = sshll.u32 (!%p162_p3), %s3637_s13, 1  ;;  %v2856_v1 = vld [vmem:[%s4480_s1 + $0x4] sm:$0xf] (!%p162_p3) }
   0x9   : > { %s4492_s18 = smov (%p27_p4, %s4490_s18), 0  ;;  %165 = sbr.rel (%p162_p3) target bundleno = 428 (0x1ac), region = 32 }
   0xa   : > { %3503 = vmatprep.subr.msk.mxu1 (!%p162_p3), %vm306_vm0, %v256_v0  ;;  %s190_s22 = sadd.s32 (!%p162_p3), %s3633_s12, %s2834_s21  ;;  %3269 = vmatprep.subr.msk.mxu0 (!%p162_p3), %vm306_vm0, %v256_v0  ;;  %v2874_v2 = vld [vmem:[%s4480_s1 + $0x8] sm:$0xf] (!%p162_p3)  ;;  %vm257_vm1 = vcmask (!%p162_p3), 31744   ;;  %v2908_v8 = vld [vmem:[%s4480_s1 + $0xc] sm:$0xf] (!%p162_p3)  ;;  %vm207_vm2 = vcmask (!%p162_p3), 64512  }
   0xb   : > { %3504 = vmatpush3.msk.msra.mxu1 (!%p162_p3), %vm306_vm0, %v256_v0  ;;  %p191_p5 = scmp.lt.s32.totalorder (!%p162_p3), %s190_s22, 3  ;;  %3270 = vmatpush3.msk.msra.mxu0 (!%p162_p3), %vm306_vm0, %v256_v0  ;;  %v2942_v11 = vld [vmem:[%s4480_s1 + $0x10] sm:$0xf] (!%p162_p3)  ;;  %v3821_v26 = vld [vmem:[%s4480_s1 + $0x14] sm:$0xf] (!%p162_p3)  ;;  %v3651_v27 = vmov (!%p162_p3), 0.0  }
   0xc   : > { %3295 = vmatprep.subr.msk.mxu1 (!%p162_p3), %vm306_vm0, %v2856_v1  ;;  %3321 = vmatprep.subr.msk.mxu0 (!%p162_p3), %vm306_vm0, %v2874_v2  ;;  %217 = vst.msk [vmem:[#allocation2 + $0x48] sm:$0xff] (!%p162_p3), %vm207_vm2, %v3651_v27  ;;  %208 = vst.msk [vmem:[#allocation2] sm:$0xff] (!%p162_p3), %vm207_vm2, %v3651_v27  ;;  %v3852_v30 = vld [vmem:[%s4480_s1 + $0x18] sm:$0xf] (!%p162_p3)  ;;  %v3044_v56 = vld [vmem:[%s4480_s1 + $0x1c] sm:$0xf] (!%p162_p3) }
   0xd   : > { %209 = vst.msk [vmem:[#allocation2 + $0x8] sm:$0xff] (!%p162_p3), %vm207_vm2, %v3651_v27  ;;  %210 = vst.msk [vmem:[#allocation2 + $0x10] sm:$0xff] (!%p162_p3), %vm207_vm2, %v3651_v27  ;;  %v3078_v57 = vld [vmem:[%s4480_s1 + $0x20] sm:$0xf] (!%p162_p3) }
   0xe   : > { %211 = vst.msk [vmem:[#allocation2 + $0x18] sm:$0xff] (!%p162_p3), %vm207_vm2, %v3651_v27  ;;  %212 = vst.msk [vmem:[#allocation2 + $0x20] sm:$0xff] (!%p162_p3), %vm207_vm2, %v3651_v27 }
   0xf   : > { %213 = vst.msk [vmem:[#allocation2 + $0x28] sm:$0xff] (!%p162_p3), %vm207_vm2, %v3651_v27  ;;  %214 = vst.msk [vmem:[#allocation2 + $0x30] sm:$0xff] (!%p162_p3), %vm207_vm2, %v3651_v27 }
  0x10   : > { %s4494_s22 = smov (!%p191_p5, %s190_s22), 3  ;;  %215 = vst.msk [vmem:[#allocation2 + $0x38] sm:$0xff] %vm207_vm2, %v3651_v27  ;;  %216 = vst.msk [vmem:[#allocation2 + $0x40] sm:$0xff] %vm207_vm2, %v3651_v27 }
  0x11   : > { %s3505_s27 = smul.u32 240, %s4494_s22  ;;  %218 = vst.msk [vmem:[#allocation2 + $0x50] sm:$0xff] %vm207_vm2, %v3651_v27  ;;  %219 = vst.msk [vmem:[#allocation2 + $0x58] sm:$0xff] %vm207_vm2, %v3651_v27  ;;  %s3115_s24 = sshll.u32 %s4494_s22, 7 }
  0x12   : > { %220 = vst.msk [vmem:[#allocation2 + $0x60] sm:$0xff] %vm207_vm2, %v3651_v27  ;;  %221 = vst.msk [vmem:[#allocation2 + $0x68] sm:$0xff] %vm207_vm2, %v3651_v27 }
  0x13   : > { %s3723_s30 = scalar_lea.vmem %s4479_s0, %s3505_s27  ;;  %222 = vst.msk [vmem:[#allocation2 + $0x70] sm:$0xff] %vm207_vm2, %v3651_v27  ;;  %223 = vst.msk [vmem:[#allocation2 + $0x78] sm:$0xff] %vm207_vm2, %v3651_v27  ;;  %s4405_s27 = scalar_lea.vmem %s4482_s3, %s3115_s24 }
  0x14   : > { %v3726_v3 = vld [vmem:[%s3723_s30 + $0x60] sm:$0xff]  ;;  %v3729_v4 = vld [vmem:[%s3723_s30 + $0x68] sm:$0xff]  ;;  %v3732_v5 = vld [vmem:[%s3723_s30 + $0x78] sm:$0xff] }
  0x15   : > { %3283 = vmatprep.mubr.msk.f32.mxu1 %vm257_vm1, %v3726_v3  ;;  %v224_v6 = vld [vmem:[%s3723_s30] sm:$0xff]  ;;  %v225_v7 = vld [vmem:[%s3723_s30 + $0x8] sm:$0xff]  ;;  %v3745_v9 = vld [vmem:[%s3723_s30 + $0x18] sm:$0xff] }
  0x16   : > { %3284 = vmatmul.mubr.msk.f32.vlgmr.msra.gmra.mrb[0].mxu1 %vm257_vm1, %v3729_v4  ;;  %3271 = vmatprep.mubr.msk.f32.mxu0 %vm257_vm1, %v224_v6  ;;  %v3751_v10 = vld [vmem:[%s3723_s30 + $0x80] sm:$0xff]  ;;  %v3758_v12 = vld [vmem:[%s3723_s30 + $0x90] sm:$0xff]  ;;  %v3776_v15 = vld [vmem:[%s3723_s30 + $0x98] sm:$0xff] }
  0x17   : > { %3296 = vmatpush3.msk.msra.mxu1 %vm306_vm0, %v2856_v1  ;;  %3286 = vmatprep.mubr.msk.f32.mxu1 %vm257_vm1, %v3732_v5  ;;  %v3764_v13 = vld [vmem:[%s3723_s30 + $0x20] sm:$0xff]  ;;  %v3770_v14 = vld [vmem:[%s3723_s30 + $0x30] sm:$0xff]  ;;  %v3781_v16 = vld [vmem:[%s3723_s30 + $0xa8] sm:$0xff] }
  0x18   : > { %3272 = vmatmul.mubr.msk.f32.vlgmr.msra.gmra.mrb[0].mxu0 %vm257_vm1, %v225_v7  ;;  %3347 = vmatprep.subr.msk.mxu1 %vm306_vm0, %v2908_v8  ;;  %v3786_v17 = vld [vmem:[%s3723_s30 + $0x38] sm:$0xff]  ;;  %v3791_v18 = vld [vmem:[%s3723_s30 + $0x48] sm:$0xff]  ;;  %v3796_v19 = vld [vmem:[%s3723_s30 + $0xb0] sm:$0xff] }
  0x19   : > { %3274 = vmatprep.mubr.msk.f32.mxu0 %vm257_vm1, %v3745_v9  ;;  %3322 = vmatpush3.msk.msra.mxu0 %vm306_vm0, %v2874_v2  ;;  %v487_v20 = vld [vmem:[%s3723_s30 + $0x1] sm:$0xff]  ;;  %v3804_v21 = vld [vmem:[%s3723_s30 + $0x50] sm:$0xff]  ;;  %v3814_v24 = vld [vmem:[%s3723_s30 + $0x19] sm:$0xff] }
  0x1a   : > { %3287 = vmatmul.mubr.msk.f32.gmra.mrb[2].mxu1 %vm257_vm1, %v3751_v10  ;;  %3373 = vmatprep.subr.msk.mxu0 %vm306_vm0, %v2942_v11  ;;  %v749_v22 = vld [vmem:[%s3723_s30 + $0x2] sm:$0xff]  ;;  %v750_v25 = vld [vmem:[%s3723_s30 + $0xa] sm:$0xff]  ;;  %v3841_v28 = vld [vmem:[%s3723_s30 + $0x1a] sm:$0xff] }
  0x1b   : > { %3289 = vmatprep.mubr.msk.f32.mxu1 %vm257_vm1, %v3758_v12  ;;  %v488_v23 = vld [vmem:[%s3723_s30 + $0x9] sm:$0xff]  ;;  %v3847_v29 = vld [vmem:[%s3723_s30 + $0x21] sm:$0xff]  ;;  %v3855_v31 = vld [vmem:[%s3723_s30 + $0x31] sm:$0xff] }
  0x1c   : > { %3275 = vmatmul.mubr.msk.f32.gmra.mrb[2].mxu0 %vm257_vm1, %v3764_v13  ;;  %v3864_v32 = vld [vmem:[%s3723_s30 + $0x22] sm:$0xff]  ;;  %v3869_v33 = vld [vmem:[%s3723_s30 + $0x32] sm:$0xff]  ;;  %v3886_v36 = vld [vmem:[%s3723_s30 + $0x3a] sm:$0xff] }
  0x1d   : > { %3277 = vmatprep.mubr.msk.f32.mxu0 %vm257_vm1, %v3770_v14  ;;  %v3876_v34 = vld [vmem:[%s3723_s30 + $0x39] sm:$0xff]  ;;  %v3879_v35 = vld [vmem:[%s3723_s30 + $0x49] sm:$0xff]  ;;  %v3896_v38 = vld [vmem:[%s3723_s30 + $0x51] sm:$0xff] }
  0x1e   : > { %3290 = vmatmul.mubr.msk.f32.gmra.mrb[4].mxu1 %vm257_vm1, %v3776_v15  ;;  %v3891_v37 = vld [vmem:[%s3723_s30 + $0x4a] sm:$0xff]  ;;  %v3899_v39 = vld [vmem:[%s3723_s30 + $0x61] sm:$0xff]  ;;  %v3906_v40 = vld [vmem:[%s3723_s30 + $0x52] sm:$0xff] }
  0x1f   : > { %3292 = vmatprep.mubr.msk.f32.mxu1 %vm257_vm1, %v3781_v16  ;;  %v3911_v41 = vld [vmem:[%s3723_s30 + $0x62] sm:$0xff]  ;;  %v3919_v43 = vld [vmem:[%s3723_s30 + $0x79] sm:$0xff]  ;;  %v3926_v44 = vld [vmem:[%s3723_s30 + $0x6a] sm:$0xff] }
  0x20   : > { %3278 = vmatmul.mubr.msk.f32.gmra.mrb[4].mxu0 %vm257_vm1, %v3786_v17  ;;  %v3916_v42 = vld [vmem:[%s3723_s30 + $0x69] sm:$0xff]  ;;  %v3931_v45 = vld [vmem:[%s3723_s30 + $0x7a] sm:$0xff]  ;;  %v3939_v47 = vld [vmem:[%s3723_s30 + $0x91] sm:$0xff] }
  0x21   : > { %3280 = vmatprep.mubr.msk.f32.mxu0 %vm257_vm1, %v3791_v18  ;;  %v3936_v46 = vld [vmem:[%s3723_s30 + $0x81] sm:$0xff]  ;;  %v3951_v49 = vld [vmem:[%s3723_s30 + $0x92] sm:$0xff]  ;;  %v3959_v51 = vld [vmem:[%s3723_s30 + $0xa9] sm:$0xff] }
  0x22   : > { %3293 = vmatmul.mubr.msk.f32.gmra.mrb[6].mxu1 %vm257_vm1, %v3796_v19  ;;  %v3946_v48 = vld [vmem:[%s3723_s30 + $0x82] sm:$0xff]  ;;  %v3956_v50 = vld [vmem:[%s3723_s30 + $0x99] sm:$0xff]  ;;  %v3971_v53 = vld [vmem:[%s3723_s30 + $0xaa] sm:$0xff] }
  0x23   : > { %3297 = vmatprep.mubr.msk.f32.mxu1 %vm257_vm1, %v487_v20  ;;  %v3966_v52 = vld [vmem:[%s3723_s30 + $0x9a] sm:$0xff]  ;;  %v3976_v54 = vld [vmem:[%s3723_s30 + $0xb1] sm:$0xff]  ;;  %v2907_v60 = vld [vmem:[%s3723_s30 + $0xc8] sm:$0xff] }
  0x24   : > { %3281 = vmatmul.mubr.msk.f32.gmra.mrb[6].mxu0 %vm257_vm1, %v3804_v21  ;;  %v3983_v55 = vld [vmem:[%s3723_s30 + $0xb2] sm:$0xff]  ;;  %v2906_v58 = vld [vmem:[%s3723_s30 + $0xc0] sm:$0xff]  ;;  %v4066_v61 = vld [vmem:[%s3723_s30 + $0xc9] sm:$0xff] }
  0x25   : > { %3323 = vmatprep.mubr.msk.f32.mxu0 %vm257_vm1, %v749_v22  ;;  %v4057_v59 = vld [vmem:[%s3723_s30 + $0xc1] sm:$0xff]  ;;  %v3008_v63 = vld [vmem:[%s3723_s30 + $0xd8] sm:$0xff]  ;;  %v2975_v0 = vld [vmem:[%s3723_s30 + $0xca] sm:$0xff] }
  0x26   : > { %3298 = vmatmul.mubr.msk.f32.vlgmr.msra.gmra.mrb[8].mxu1 %vm257_vm1, %v488_v23  ;;  %v2974_v62 = vld [vmem:[%s3723_s30 + $0xc2] sm:$0xff]  ;;  %v3042_v2 = vld [vmem:[%s3723_s30 + $0xd9] sm:$0xff] }
  0x27   : > { %3348 = vmatpush3.msk.msra.mxu1 %vm306_vm0, %v2908_v8  ;;  %3300 = vmatprep.mubr.msk.f32.mxu1 %vm257_vm1, %v3814_v24  ;;  %v3009_v1 = vld [vmem:[%s3723_s30 + $0xe0] sm:$0xff]  ;;  %v249_v6 = vld [vmem:[#allocation2 + $0x48] sm:$0xff] }
  0x28   : > { %3324 = vmatmul.mubr.msk.f32.vlgmr.msra.gmra.mrb[8].mxu0 %vm257_vm1, %v750_v25  ;;  %3399 = vmatprep.subr.msk.mxu1 %vm306_vm0, %v3821_v26  ;;  %v248_v7 = vld [vmem:[#allocation2 + $0x40] sm:$0xff] }
  0x29   : > { %3374 = vmatpush3.msk.msra.mxu0 %vm306_vm0, %v2942_v11  ;;  %3326 = vmatprep.mubr.msk.f32.mxu0 %vm257_vm1, %v3841_v28 }
  0x2a   : > { %3301 = vmatmul.mubr.msk.f32.gmra.mrb[10].mxu1 %vm257_vm1, %v3847_v29  ;;  %3425 = vmatprep.subr.msk.mxu0 %vm306_vm0, %v3852_v30 }
  0x2b   : > { %3303 = vmatprep.mubr.msk.f32.mxu1 %vm257_vm1, %v3855_v31 }
  0x2c   : > { %3327 = vmatmul.mubr.msk.f32.gmra.mrb[10].mxu0 %vm257_vm1, %v3864_v32 }
  0x2d   : > { %3329 = vmatprep.mubr.msk.f32.mxu0 %vm257_vm1, %v3869_v33 }
  0x2e   : > { %3304 = vmatmul.mubr.msk.f32.gmra.mrb[12].mxu1 %vm257_vm1, %v3876_v34 }
  0x2f   : > { %3306 = vmatprep.mubr.msk.f32.mxu1 %vm257_vm1, %v3879_v35 }
  0x30   : > { %3330 = vmatmul.mubr.msk.f32.gmra.mrb[12].mxu0 %vm257_vm1, %v3886_v36 }
  0x31   : > { %3332 = vmatprep.mubr.msk.f32.mxu0 %vm257_vm1, %v3891_v37 }
  0x32   : > { %3307 = vmatmul.mubr.msk.f32.gmra.mrb[14].mxu1 %vm257_vm1, %v3896_v38 }
  0x33   : > { %3309 = vmatprep.mubr.msk.f32.mxu1 %vm257_vm1, %v3899_v39 }
  0x34   : > { %3333 = vmatmul.mubr.msk.f32.gmra.mrb[14].mxu0 %vm257_vm1, %v3906_v40 }
  0x35   : > { %3335 = vmatprep.mubr.msk.f32.mxu0 %vm257_vm1, %v3911_v41 }
  0x36   : > { %3310 = vmatmul.mubr.msk.f32.gmra.mrb[16].mxu1 %vm257_vm1, %v3916_v42 }
  0x37   : > { %3312 = vmatprep.mubr.msk.f32.mxu1 %vm257_vm1, %v3919_v43 }
  0x38   : > { %3336 = vmatmul.mubr.msk.f32.gmra.mrb[16].mxu0 %vm257_vm1, %v3926_v44 }
  0x39   : > { %3338 = vmatprep.mubr.msk.f32.mxu0 %vm257_vm1, %v3931_v45 }
  0x3a   : > { %3313 = vmatmul.mubr.msk.f32.gmra.mrb[18].mxu1 %vm257_vm1, %v3936_v46 }
  0x3b   : > { %3315 = vmatprep.mubr.msk.f32.mxu1 %vm257_vm1, %v3939_v47 }
  0x3c   : > { %3339 = vmatmul.mubr.msk.f32.gmra.mrb[18].mxu0 %vm257_vm1, %v3946_v48 }
  0x3d   : > { %3341 = vmatprep.mubr.msk.f32.mxu0 %vm257_vm1, %v3951_v49 }
  0x3e   : > { %3316 = vmatmul.mubr.msk.f32.gmra.mrb[20].mxu1 %vm257_vm1, %v3956_v50 }
  0x3f   : > { %3318 = vmatprep.mubr.msk.f32.mxu1 %vm257_vm1, %v3959_v51 }
  0x40   : > { %3342 = vmatmul.mubr.msk.f32.gmra.mrb[20].mxu0 %vm257_vm1, %v3966_v52 }
  0x41   : > { %3344 = vmatprep.mubr.msk.f32.mxu0 %vm257_vm1, %v3971_v53 }
  0x42   : > { %3319 = vmatmul.mubr.msk.f32.gmra.mrb[22].mxu1 %vm257_vm1, %v3976_v54 }
  0x43   : > { %3349 = vmatprep.mubr.msk.f32.mxu1 %vm257_vm1, %v3745_v9  ;;  %v241_v9 = vld [vmem:[#allocation2 + $0x8] sm:$0xff] }
  0x44   : > { %3345 = vmatmul.mubr.msk.f32.gmra.mrb[22].mxu0 %vm257_vm1, %v3983_v55 }
  0x45   : > { %3375 = vmatprep.mubr.msk.f32.mxu0 %vm257_vm1, %v3814_v24  ;;  %v242_v24 = vld [vmem:[#allocation2 + $0x10] sm:$0xff] }
  0x46   : > { %3350 = vmatmul.mubr.msk.f32.vlgmr.msra.gmra.mrb[24].mxu1 %vm257_vm1, %v3764_v13 }
  0x47   : > { %3400 = vmatpush3.msk.msra.mxu1 %vm306_vm0, %v3821_v26  ;;  %3352 = vmatprep.mubr.msk.f32.mxu1 %vm257_vm1, %v3770_v14  ;;  %v253_v26 = vld [vmem:[#allocation2 + $0x68] sm:$0xff] }
  0x48   : > { %3376 = vmatmul.mubr.msk.f32.vlgmr.msra.gmra.mrb[24].mxu0 %vm257_vm1, %v3847_v29  ;;  %3451 = vmatprep.subr.msk.mxu1 %vm306_vm0, %v3044_v56 }
  0x49   : > { %3426 = vmatpush3.msk.msra.mxu0 %vm306_vm0, %v3852_v30  ;;  %3378 = vmatprep.mubr.msk.f32.mxu0 %vm257_vm1, %v3855_v31 }
  0x4a   : > { %3353 = vmatmul.mubr.msk.f32.gmra.mrb[26].mxu1 %vm257_vm1, %v3786_v17  ;;  %3477 = vmatprep.subr.msk.mxu0 %vm306_vm0, %v3078_v57 }
  0x4b   : > { %3355 = vmatprep.mubr.msk.f32.mxu1 %vm257_vm1, %v3791_v18 }
  0x4c   : > { %3379 = vmatmul.mubr.msk.f32.gmra.mrb[26].mxu0 %vm257_vm1, %v3876_v34 }
  0x4d   : > { %3381 = vmatprep.mubr.msk.f32.mxu0 %vm257_vm1, %v3879_v35 }
  0x4e   : > { %3356 = vmatmul.mubr.msk.f32.gmra.mrb[28].mxu1 %vm257_vm1, %v3804_v21 }
  0x4f   : > { %3358 = vmatprep.mubr.msk.f32.mxu1 %vm257_vm1, %v3726_v3 }
  0x50   : > { %3382 = vmatmul.mubr.msk.f32.gmra.mrb[28].mxu0 %vm257_vm1, %v3896_v38 }
  0x51   : > { %3384 = vmatprep.mubr.msk.f32.mxu0 %vm257_vm1, %v3899_v39 }
  0x52   : > { %3359 = vmatmul.mubr.msk.f32.gmra.mrb[30].mxu1 %vm257_vm1, %v3729_v4 }
  0x53   : > { %3361 = vmatprep.mubr.msk.f32.mxu1 %vm257_vm1, %v3732_v5 }
  0x54   : > { %3385 = vmatmul.mubr.msk.f32.gmra.mrb[30].mxu0 %vm257_vm1, %v3916_v42 }
  0x55   : > { %3387 = vmatprep.mubr.msk.f32.mxu0 %vm257_vm1, %v3919_v43 }
  0x56   : > { %3362 = vmatmul.mubr.msk.f32.gmra.mrb[32].mxu1 %vm257_vm1, %v3751_v10 }
  0x57   : > { %3364 = vmatprep.mubr.msk.f32.mxu1 %vm257_vm1, %v3758_v12 }
  0x58   : > { %3388 = vmatmul.mubr.msk.f32.gmra.mrb[32].mxu0 %vm257_vm1, %v3936_v46 }
  0x59   : > { %3390 = vmatprep.mubr.msk.f32.mxu0 %vm257_vm1, %v3939_v47 }
  0x5a   : > { %3365 = vmatmul.mubr.msk.f32.gmra.mrb[34].mxu1 %vm257_vm1, %v3776_v15 }
  0x5b   : > { %3367 = vmatprep.mubr.msk.f32.mxu1 %vm257_vm1, %v3781_v16 }
  0x5c   : > { %3391 = vmatmul.mubr.msk.f32.gmra.mrb[34].mxu0 %vm257_vm1, %v3956_v50 }
  0x5d   : > { %3393 = vmatprep.mubr.msk.f32.mxu0 %vm257_vm1, %v3959_v51 }
  0x5e   : > { %3368 = vmatmul.mubr.msk.f32.gmra.mrb[36].mxu1 %vm257_vm1, %v3796_v19 }
  0x5f   : > { %3370 = vmatprep.mubr.msk.f32.mxu1 %vm257_vm1, %v2906_v58 }
  0x60   : > { %3394 = vmatmul.mubr.msk.f32.gmra.mrb[36].mxu0 %vm257_vm1, %v3976_v54 }
  0x61   : > { %3396 = vmatprep.mubr.msk.f32.mxu0 %vm257_vm1, %v4057_v59 }
  0x62   : > { %3371 = vmatmul.mubr.msk.f32.gmra.mrb[38].mxu1 %vm257_vm1, %v2907_v60 }
  0x63   : > { %3401 = vmatprep.mubr.msk.f32.mxu1 %vm257_vm1, %v3841_v28  ;;  %v252_v28 = vld [vmem:[#allocation2 + $0x60] sm:$0xff] }
  0x64   : > { %3397 = vmatmul.mubr.msk.f32.gmra.mrb[38].mxu0 %vm257_vm1, %v4066_v61 }
  0x65   : > { %3427 = vmatprep.mubr.msk.f32.mxu0 %vm257_vm1, %v3770_v14  ;;  %v251_v14 = vld [vmem:[#allocation2 + $0x58] sm:$0xff] }
  0x66   : > { %3402 = vmatmul.mubr.msk.f32.vlgmr.msra.gmra.mrb[40].mxu1 %vm257_vm1, %v3864_v32 }
  0x67   : > { %3452 = vmatpush3.msk.msra.mxu1 %vm306_vm0, %v3044_v56  ;;  %3404 = vmatprep.mubr.msk.f32.mxu1 %vm257_vm1, %v3869_v33 }
  0x68   : > { %3428 = vmatmul.mubr.msk.f32.vlgmr.msra.gmra.mrb[40].mxu0 %vm257_vm1, %v3786_v17 }
  0x69   : > { %3478 = vmatpush3.msk.msra.mxu0 %vm306_vm0, %v3078_v57  ;;  %3430 = vmatprep.mubr.msk.f32.mxu0 %vm257_vm1, %v3791_v18 }
  0x6a   : > { %3405 = vmatmul.mubr.msk.f32.gmra.mrb[42].mxu1 %vm257_vm1, %v3886_v36 }
  0x6b   : > { %3407 = vmatprep.mubr.msk.f32.mxu1 %vm257_vm1, %v3891_v37 }
  0x6c   : > { %3431 = vmatmul.mubr.msk.f32.gmra.mrb[42].mxu0 %vm257_vm1, %v3804_v21  ;;  %v243_v21 = vld [vmem:[#allocation2 + $0x18] sm:$0xff] }
  0x6d   : > { %3433 = vmatprep.mubr.msk.f32.mxu0 %vm257_vm1, %v3726_v3  ;;  %v3076_v3 = vld [vmem:[%s3723_s30 + $0xda] sm:$0xff] }
  0x6e   : > { %3408 = vmatmul.mubr.msk.f32.gmra.mrb[44].mxu1 %vm257_vm1, %v3906_v40 }
  0x6f   : > { %3410 = vmatprep.mubr.msk.f32.mxu1 %vm257_vm1, %v3911_v41 }
  0x70   : > { %3434 = vmatmul.mubr.msk.f32.gmra.mrb[44].mxu0 %vm257_vm1, %v3729_v4  ;;  %v3043_v4 = vld [vmem:[%s3723_s30 + $0xe1] sm:$0xff] }
  0x71   : > { %3436 = vmatprep.mubr.msk.f32.mxu0 %vm257_vm1, %v3732_v5  ;;  %v3077_v5 = vld [vmem:[%s3723_s30 + $0xe2] sm:$0xff] }
  0x72   : > { %3411 = vmatmul.mubr.msk.f32.gmra.mrb[46].mxu1 %vm257_vm1, %v3926_v44 }
  0x73   : > { %3413 = vmatprep.mubr.msk.f32.mxu1 %vm257_vm1, %v3931_v45 }
  0x74   : > { %3437 = vmatmul.mubr.msk.f32.gmra.mrb[46].mxu0 %vm257_vm1, %v3751_v10 }
  0x75   : > { %3439 = vmatprep.mubr.msk.f32.mxu0 %vm257_vm1, %v3758_v12  ;;  %v240_v12 = vld [vmem:[#allocation2] sm:$0xff] }
  0x76   : > { %3414 = vmatmul.mubr.msk.f32.gmra.mrb[48].mxu1 %vm257_vm1, %v3946_v48 }
  0x77   : > { %3416 = vmatprep.mubr.msk.f32.mxu1 %vm257_vm1, %v3951_v49 }
  0x78   : > { %3440 = vmatmul.mubr.msk.f32.gmra.mrb[48].mxu0 %vm257_vm1, %v3776_v15 }
  0x79   : > { %3442 = vmatprep.mubr.msk.f32.mxu0 %vm257_vm1, %v3781_v16  ;;  %v250_v16 = vld [vmem:[#allocation2 + $0x50] sm:$0xff] }
  0x7a   : > { %3417 = vmatmul.mubr.msk.f32.gmra.mrb[50].mxu1 %vm257_vm1, %v3966_v52 }
  0x7b   : > { %3419 = vmatprep.mubr.msk.f32.mxu1 %vm257_vm1, %v3971_v53 }
  0x7c   : > { %3443 = vmatmul.mubr.msk.f32.gmra.mrb[50].mxu0 %vm257_vm1, %v3796_v19 }
  0x7d   : > { %3445 = vmatprep.mubr.msk.f32.mxu0 %vm257_vm1, %v2906_v58 }
  0x7e   : > { %3420 = vmatmul.mubr.msk.f32.gmra.mrb[52].mxu1 %vm257_vm1, %v3983_v55 }
  0x7f   : > { %3422 = vmatprep.mubr.msk.f32.mxu1 %vm257_vm1, %v2974_v62 }
  0x80   : > { %3446 = vmatmul.mubr.msk.f32.gmra.mrb[52].mxu0 %vm257_vm1, %v2907_v60 }
  0x81   : > { %3448 = vmatprep.mubr.msk.f32.mxu0 %vm257_vm1, %v3008_v63 }
  0x82   : > { %3423 = vmatmul.mubr.msk.f32.gmra.mrb[54].mxu1 %vm257_vm1, %v2975_v0 }
  0x83   : > { %3453 = vmatprep.mubr.msk.f32.mxu1 %vm257_vm1, %v3855_v31 }
  0x84   : > { %3449 = vmatmul.mubr.msk.f32.gmra.mrb[54].mxu0 %vm257_vm1, %v3009_v1 }
  0x85   : > { %3479 = vmatprep.mubr.msk.f32.mxu0 %vm257_vm1, %v3869_v33  ;;  %v245_v33 = vld [vmem:[#allocation2 + $0x28] sm:$0xff] }
  0x86   : > { %3454 = vmatmul.mubr.msk.f32.vlgmr.msra.gmra.mrb[56].mxu1 %vm257_vm1, %v3876_v34 }
  0x87   : > { %3456 = vmatprep.mubr.msk.f32.mxu1 %vm257_vm1, %v3879_v35 }
  0x88   : > { %3480 = vmatmul.mubr.msk.f32.vlgmr.msra.gmra.mrb[56].mxu0 %vm257_vm1, %v3886_v36  ;;  %v244_v36 = vld [vmem:[#allocation2 + $0x20] sm:$0xff] }
  0x89   : > { %3482 = vmatprep.mubr.msk.f32.mxu0 %vm257_vm1, %v3891_v37 }
  0x8a   : > { %3457 = vmatmul.mubr.msk.f32.gmra.mrb[58].mxu1 %vm257_vm1, %v3896_v38  ;;  %v255_v38 = vld [vmem:[#allocation2 + $0x78] sm:$0xff] }
  0x8b   : > { %3459 = vmatprep.mubr.msk.f32.mxu1 %vm257_vm1, %v3899_v39 }
  0x8c   : > { %3483 = vmatmul.mubr.msk.f32.gmra.mrb[58].mxu0 %vm257_vm1, %v3906_v40  ;;  %v254_v40 = vld [vmem:[#allocation2 + $0x70] sm:$0xff] }
  0x8d   : > { %3485 = vmatprep.mubr.msk.f32.mxu0 %vm257_vm1, %v3911_v41 }
  0x8e   : > { %3460 = vmatmul.mubr.msk.f32.gmra.mrb[60].mxu1 %vm257_vm1, %v3916_v42 }
  0x8f   : > { %3462 = vmatprep.mubr.msk.f32.mxu1 %vm257_vm1, %v3919_v43 }
  0x90   : > { %3486 = vmatmul.mubr.msk.f32.gmra.mrb[60].mxu0 %vm257_vm1, %v3926_v44 }
  0x91   : > { %3488 = vmatprep.mubr.msk.f32.mxu0 %vm257_vm1, %v3931_v45  ;;  %v247_v45 = vld [vmem:[#allocation2 + $0x38] sm:$0xff] }
  0x92   : > { %3463 = vmatmul.mubr.msk.f32.gmra.mrb[62].mxu1 %vm257_vm1, %v3936_v46 }
  0x93   : > { %3465 = vmatprep.mubr.msk.f32.mxu1 %vm257_vm1, %v3939_v47 }
  0x94   : > { %3489 = vmatmul.mubr.msk.f32.gmra.mrb[62].mxu0 %vm257_vm1, %v3946_v48  ;;  %v246_v48 = vld [vmem:[#allocation2 + $0x30] sm:$0xff] }
  0x95   : > { %3491 = vmatprep.mubr.msk.f32.mxu0 %vm257_vm1, %v3951_v49 }
  0x96   : > { %3466 = vmatmul.mubr.msk.f32.gmra.mrb[64].mxu1 %vm257_vm1, %v3956_v50 }
  0x97   : > { %3468 = vmatprep.mubr.msk.f32.mxu1 %vm257_vm1, %v3959_v51 }
  0x98   : > { %3492 = vmatmul.mubr.msk.f32.gmra.mrb[64].mxu0 %vm257_vm1, %v3966_v52 }
  0x99   : > { %3494 = vmatprep.mubr.msk.f32.mxu0 %vm257_vm1, %v3971_v53 }
  0x9a   : > { %3469 = vmatmul.mubr.msk.f32.gmra.mrb[66].mxu1 %vm257_vm1, %v3976_v54 }
  0x9b   : > { %3471 = vmatprep.mubr.msk.f32.mxu1 %vm257_vm1, %v4057_v59 }
  0x9c   : > { %3495 = vmatmul.mubr.msk.f32.gmra.mrb[66].mxu0 %vm257_vm1, %v3983_v55 }
  0x9d   : > { %3497 = vmatprep.mubr.msk.f32.mxu0 %vm257_vm1, %v2974_v62 }
  0x9e   : > { %3472 = vmatmul.mubr.msk.f32.gmra.mrb[68].mxu1 %vm257_vm1, %v4066_v61 }
  0x9f   : > { %3474 = vmatprep.mubr.msk.f32.mxu1 %vm257_vm1, %v3042_v2 }
  0xa0   : > { %3498 = vmatmul.mubr.msk.f32.gmra.mrb[68].mxu0 %vm257_vm1, %v2975_v0 }
  0xa1   : > { %3500 = vmatprep.mubr.msk.f32.mxu0 %vm257_vm1, %v3076_v3 }
  0xa2   : > { %3475 = vmatmul.mubr.msk.f32.gmra.mrb[70].mxu1 %vm257_vm1, %v3043_v4 }
  0xa4   : > { %3501 = vmatmul.mubr.msk.f32.gmra.mrb[70].mxu0 %vm257_vm1, %v3077_v5 }
  0xe9   : > { %v3285_v8 = vpop.f32.mrb[0].mxu1 }
  0xea   : > { %v464_v10 = vadd.f32 %v3285_v8, %v249_v6  ;;  %v416_v11 = vpop.f32.mrb[1].mxu1 }
  0xeb   : > { %v463_v13 = vadd.f32 %v416_v11, %v248_v7  ;;  %v3273_v15 = vpop.f32.mrb[0].mxu0 }
  0xec   : > { %480 = vst.msk [vmem:[#allocation2 + $0x48] sm:$0xff] %vm207_vm2, %v464_v10  ;;  %v456_v17 = vadd.f32 %v3273_v15, %v241_v9  ;;  %v376_v18 = vpop.f32.mrb[1].mxu0 }
  0xed   : > { %479 = vst.msk [vmem:[#allocation2 + $0x40] sm:$0xff] %vm207_vm2, %v463_v13  ;;  %v3288_v19 = vpop.f32.mrb[2].mxu1  ;;  %v455_v20 = vadd.f32 %v376_v18, %v240_v12 }
  0xee   : > { %v466_v22 = vadd.f32 %v3288_v19, %v251_v14  ;;  %v426_v23 = vpop.f32.mrb[3].mxu1  ;;  %472 = vst.msk [vmem:[#allocation2 + $0x8] sm:$0xff] %vm207_vm2, %v456_v17 }
  0xef   : > { %v465_v25 = vadd.f32 %v426_v23, %v250_v16  ;;  %471 = vst.msk [vmem:[#allocation2] sm:$0xff] %vm207_vm2, %v455_v20  ;;  %v3276_v27 = vpop.f32.mrb[2].mxu0 }
  0xf0   : > { %482 = vst.msk [vmem:[#allocation2 + $0x58] sm:$0xff] %vm207_vm2, %v466_v22  ;;  %v458_v29 = vadd.f32 %v3276_v27, %v243_v21  ;;  %v386_v30 = vpop.f32.mrb[3].mxu0 }
  0xf1   : > { %481 = vst.msk [vmem:[#allocation2 + $0x50] sm:$0xff] %vm207_vm2, %v465_v25  ;;  %v3291_v31 = vpop.f32.mrb[4].mxu1  ;;  %v457_v32 = vadd.f32 %v386_v30, %v242_v24 }
  0xf2   : > { %v468_v34 = vadd.f32 %v3291_v31, %v253_v26  ;;  %v436_v35 = vpop.f32.mrb[5].mxu1  ;;  %474 = vst.msk [vmem:[#allocation2 + $0x18] sm:$0xff] %vm207_vm2, %v458_v29 }
  0xf3   : > { %v467_v37 = vadd.f32 %v436_v35, %v252_v28  ;;  %473 = vst.msk [vmem:[#allocation2 + $0x10] sm:$0xff] %vm207_vm2, %v457_v32  ;;  %v3279_v39 = vpop.f32.mrb[4].mxu0  ;;  %v512_v30 = vld [vmem:[#allocation2 + $0x48] sm:$0xff] }
  0xf4   : > { %484 = vst.msk [vmem:[#allocation2 + $0x68] sm:$0xff] %vm207_vm2, %v468_v34  ;;  %v460_v41 = vadd.f32 %v3279_v39, %v245_v33  ;;  %v396_v42 = vpop.f32.mrb[5].mxu0  ;;  %v511_v33 = vld [vmem:[#allocation2 + $0x40] sm:$0xff] }
  0xf5   : > { %483 = vst.msk [vmem:[#allocation2 + $0x60] sm:$0xff] %vm207_vm2, %v467_v37  ;;  %v3294_v43 = vpop.f32.mrb[6].mxu1  ;;  %v459_v44 = vadd.f32 %v396_v42, %v244_v36  ;;  %v504_v50 = vld [vmem:[#allocation2 + $0x8] sm:$0xff] }
  0xf6   : > { %v470_v46 = vadd.f32 %v3294_v43, %v255_v38  ;;  %v446_v47 = vpop.f32.mrb[7].mxu1  ;;  %476 = vst.msk [vmem:[#allocation2 + $0x28] sm:$0xff] %vm207_vm2, %v460_v41  ;;  %v503_v52 = vld [vmem:[#allocation2] sm:$0xff] }
  0xf7   : > { %v469_v49 = vadd.f32 %v446_v47, %v254_v40  ;;  %475 = vst.msk [vmem:[#allocation2 + $0x20] sm:$0xff] %vm207_vm2, %v459_v44  ;;  %v3282_v51 = vpop.f32.mrb[6].mxu0  ;;  %v514_v42 = vld [vmem:[#allocation2 + $0x58] sm:$0xff] }
  0xf8   : > { %486 = vst.msk [vmem:[#allocation2 + $0x78] sm:$0xff] %vm207_vm2, %v470_v46  ;;  %v462_v53 = vadd.f32 %v3282_v51, %v247_v45  ;;  %v406_v54 = vpop.f32.mrb[7].mxu0  ;;  %v513_v45 = vld [vmem:[#allocation2 + $0x50] sm:$0xff] }
  0xf9   : > { %485 = vst.msk [vmem:[#allocation2 + $0x70] sm:$0xff] %vm207_vm2, %v469_v49  ;;  %v3299_v55 = vpop.f32.mrb[8].mxu1  ;;  %v461_v56 = vadd.f32 %v406_v54, %v246_v48  ;;  %v506_v60 = vld [vmem:[#allocation2 + $0x18] sm:$0xff] }
  0xfa   : > { %v718_v57 = vadd.f32 %v3299_v55, %v504_v50  ;;  %v638_v58 = vpop.f32.mrb[9].mxu1  ;;  %478 = vst.msk [vmem:[#allocation2 + $0x38] sm:$0xff] %vm207_vm2, %v462_v53  ;;  %v505_v62 = vld [vmem:[#allocation2 + $0x10] sm:$0xff] }
  0xfb   : > { %v717_v59 = vadd.f32 %v638_v58, %v503_v52  ;;  %477 = vst.msk [vmem:[#allocation2 + $0x30] sm:$0xff] %vm207_vm2, %v461_v56  ;;  %v3325_v61 = vpop.f32.mrb[8].mxu0  ;;  %v516_v54 = vld [vmem:[#allocation2 + $0x68] sm:$0xff] }
  0xfc   : > { %734 = vst.msk [vmem:[#allocation2 + $0x8] sm:$0xff] %vm207_vm2, %v718_v57  ;;  %v900_v63 = vpop.f32.mrb[9].mxu0  ;;  %v515_v57 = vld [vmem:[#allocation2 + $0x60] sm:$0xff] }
  0xfd   : > { %733 = vst.msk [vmem:[#allocation2] sm:$0xff] %vm207_vm2, %v717_v59  ;;  %v3302_v0 = vpop.f32.mrb[10].mxu1  ;;  %v508_v4 = vld [vmem:[#allocation2 + $0x28] sm:$0xff] }
  0xfe   : > { %v720_v1 = vadd.f32 %v3302_v0, %v506_v60  ;;  %v648_v2 = vpop.f32.mrb[11].mxu1  ;;  %v507_v6 = vld [vmem:[#allocation2 + $0x20] sm:$0xff] }
  0xff   : > { %v719_v3 = vadd.f32 %v648_v2, %v505_v62  ;;  %v3328_v5 = vpop.f32.mrb[10].mxu0  ;;  %v518_v2 = vld [vmem:[#allocation2 + $0x78] sm:$0xff] }
 0x100   : > { %736 = vst.msk [vmem:[#allocation2 + $0x18] sm:$0xff] %vm207_vm2, %v720_v1  ;;  %v910_v7 = vpop.f32.mrb[11].mxu0 }
 0x101   : > { %735 = vst.msk [vmem:[#allocation2 + $0x10] sm:$0xff] %vm207_vm2, %v719_v3  ;;  %v3305_v8 = vpop.f32.mrb[12].mxu1  ;;  %v510_v13 = vld [vmem:[#allocation2 + $0x38] sm:$0xff] }
 0x102   : > { %v722_v9 = vadd.f32 %v3305_v8, %v508_v4  ;;  %v658_v10 = vpop.f32.mrb[13].mxu1  ;;  %v509_v17 = vld [vmem:[#allocation2 + $0x30] sm:$0xff] }
 0x103   : > { %v721_v11 = vadd.f32 %v658_v10, %v507_v6  ;;  %v766_v12 = vld [vmem:[#allocation2 + $0x8] sm:$0xff]  ;;  %v3331_v14 = vpop.f32.mrb[12].mxu0 }
 0x104   : > { %738 = vst.msk [vmem:[#allocation2 + $0x28] sm:$0xff] %vm207_vm2, %v722_v9  ;;  %v980_v15 = vadd.f32 %v3325_v61, %v766_v12  ;;  %v765_v16 = vld [vmem:[#allocation2] sm:$0xff]  ;;  %v920_v18 = vpop.f32.mrb[13].mxu0 }
 0x105   : > { %737 = vst.msk [vmem:[#allocation2 + $0x20] sm:$0xff] %vm207_vm2, %v721_v11  ;;  %v979_v19 = vadd.f32 %v900_v63, %v765_v16  ;;  %v3308_v20 = vpop.f32.mrb[14].mxu1 }
 0x106   : > { %996 = vst.msk [vmem:[#allocation2 + $0x8] sm:$0xff] %vm207_vm2, %v980_v15  ;;  %v724_v21 = vadd.f32 %v3308_v20, %v510_v13  ;;  %v668_v22 = vpop.f32.mrb[15].mxu1 }
 0x107   : > { %995 = vst.msk [vmem:[#allocation2] sm:$0xff] %vm207_vm2, %v979_v19  ;;  %v723_v23 = vadd.f32 %v668_v22, %v509_v17  ;;  %v768_v24 = vld [vmem:[#allocation2 + $0x18] sm:$0xff]  ;;  %v3334_v25 = vpop.f32.mrb[14].mxu0 }
 0x108   : > { %740 = vst.msk [vmem:[#allocation2 + $0x38] sm:$0xff] %vm207_vm2, %v724_v21  ;;  %v982_v26 = vadd.f32 %v3328_v5, %v768_v24  ;;  %v767_v27 = vld [vmem:[#allocation2 + $0x10] sm:$0xff]  ;;  %v930_v28 = vpop.f32.mrb[15].mxu0 }
 0x109   : > { %739 = vst.msk [vmem:[#allocation2 + $0x30] sm:$0xff] %vm207_vm2, %v723_v23  ;;  %v981_v29 = vadd.f32 %v910_v7, %v767_v27  ;;  %v3311_v31 = vpop.f32.mrb[16].mxu1  ;;  %v517_v5 = vld [vmem:[#allocation2 + $0x70] sm:$0xff] }
 0x10a   : > { %998 = vst.msk [vmem:[#allocation2 + $0x18] sm:$0xff] %vm207_vm2, %v982_v26  ;;  %v726_v32 = vadd.f32 %v3311_v31, %v512_v30  ;;  %v678_v34 = vpop.f32.mrb[17].mxu1 }
 0x10b   : > { %997 = vst.msk [vmem:[#allocation2 + $0x10] sm:$0xff] %vm207_vm2, %v981_v29  ;;  %v725_v35 = vadd.f32 %v678_v34, %v511_v33  ;;  %v770_v36 = vld [vmem:[#allocation2 + $0x28] sm:$0xff]  ;;  %v3337_v37 = vpop.f32.mrb[16].mxu0 }
 0x10c   : > { %742 = vst.msk [vmem:[#allocation2 + $0x48] sm:$0xff] %vm207_vm2, %v726_v32  ;;  %v984_v38 = vadd.f32 %v3331_v14, %v770_v36  ;;  %v769_v39 = vld [vmem:[#allocation2 + $0x20] sm:$0xff]  ;;  %v940_v40 = vpop.f32.mrb[17].mxu0 }
 0x10d   : > { %741 = vst.msk [vmem:[#allocation2 + $0x40] sm:$0xff] %vm207_vm2, %v725_v35  ;;  %v983_v41 = vadd.f32 %v920_v18, %v769_v39  ;;  %v3314_v43 = vpop.f32.mrb[18].mxu1  ;;  %v1029_v14 = vld [vmem:[#allocation2 + $0x8] sm:$0xff] }
 0x10e   : > { %1000 = vst.msk [vmem:[#allocation2 + $0x28] sm:$0xff] %vm207_vm2, %v984_v38  ;;  %v728_v44 = vadd.f32 %v3314_v43, %v514_v42  ;;  %v688_v46 = vpop.f32.mrb[19].mxu1  ;;  %v1028_v17 = vld [vmem:[#allocation2] sm:$0xff] }
 0x10f   : > { %999 = vst.msk [vmem:[#allocation2 + $0x20] sm:$0xff] %vm207_vm2, %v983_v41  ;;  %v727_v47 = vadd.f32 %v688_v46, %v513_v45  ;;  %v772_v48 = vld [vmem:[#allocation2 + $0x38] sm:$0xff]  ;;  %v3340_v49 = vpop.f32.mrb[18].mxu0 }
 0x110   : > { %744 = vst.msk [vmem:[#allocation2 + $0x58] sm:$0xff] %vm207_vm2, %v728_v44  ;;  %v986_v50 = vadd.f32 %v3334_v25, %v772_v48  ;;  %v771_v51 = vld [vmem:[#allocation2 + $0x30] sm:$0xff]  ;;  %v950_v52 = vpop.f32.mrb[19].mxu0 }
 0x111   : > { %743 = vst.msk [vmem:[#allocation2 + $0x50] sm:$0xff] %vm207_vm2, %v727_v47  ;;  %v985_v53 = vadd.f32 %v930_v28, %v771_v51  ;;  %v3317_v55 = vpop.f32.mrb[20].mxu1  ;;  %v1031_v26 = vld [vmem:[#allocation2 + $0x18] sm:$0xff] }
 0x112   : > { %1002 = vst.msk [vmem:[#allocation2 + $0x38] sm:$0xff] %vm207_vm2, %v986_v50  ;;  %v730_v56 = vadd.f32 %v3317_v55, %v516_v54  ;;  %v698_v58 = vpop.f32.mrb[21].mxu1  ;;  %v1030_v29 = vld [vmem:[#allocation2 + $0x10] sm:$0xff] }
 0x113   : > { %1001 = vst.msk [vmem:[#allocation2 + $0x30] sm:$0xff] %vm207_vm2, %v985_v53  ;;  %v729_v59 = vadd.f32 %v698_v58, %v515_v57  ;;  %v774_v60 = vld [vmem:[#allocation2 + $0x48] sm:$0xff]  ;;  %v3343_v61 = vpop.f32.mrb[20].mxu0 }
 0x114   : > { %746 = vst.msk [vmem:[#allocation2 + $0x68] sm:$0xff] %vm207_vm2, %v730_v56  ;;  %v988_v62 = vadd.f32 %v3337_v37, %v774_v60  ;;  %v773_v63 = vld [vmem:[#allocation2 + $0x40] sm:$0xff]  ;;  %v960_v0 = vpop.f32.mrb[21].mxu0 }
 0x115   : > { %745 = vst.msk [vmem:[#allocation2 + $0x60] sm:$0xff] %vm207_vm2, %v729_v59  ;;  %v987_v1 = vadd.f32 %v940_v40, %v773_v63  ;;  %v3320_v3 = vpop.f32.mrb[22].mxu1  ;;  %v1033_v38 = vld [vmem:[#allocation2 + $0x28] sm:$0xff] }
 0x116   : > { %1004 = vst.msk [vmem:[#allocation2 + $0x48] sm:$0xff] %vm207_vm2, %v988_v62  ;;  %v732_v4 = vadd.f32 %v3320_v3, %v518_v2  ;;  %v708_v6 = vpop.f32.mrb[23].mxu1  ;;  %v1032_v41 = vld [vmem:[#allocation2 + $0x20] sm:$0xff] }
 0x117   : > { %1003 = vst.msk [vmem:[#allocation2 + $0x40] sm:$0xff] %vm207_vm2, %v987_v1  ;;  %v731_v7 = vadd.f32 %v708_v6, %v517_v5  ;;  %v776_v8 = vld [vmem:[#allocation2 + $0x58] sm:$0xff]  ;;  %v3346_v9 = vpop.f32.mrb[22].mxu0 }
 0x118   : > { %748 = vst.msk [vmem:[#allocation2 + $0x78] sm:$0xff] %vm207_vm2, %v732_v4  ;;  %v990_v10 = vadd.f32 %v3340_v49, %v776_v8  ;;  %v775_v11 = vld [vmem:[#allocation2 + $0x50] sm:$0xff]  ;;  %v970_v12 = vpop.f32.mrb[23].mxu0 }
 0x119   : > { %747 = vst.msk [vmem:[#allocation2 + $0x70] sm:$0xff] %vm207_vm2, %v731_v7  ;;  %v989_v13 = vadd.f32 %v950_v52, %v775_v11  ;;  %v3351_v15 = vpop.f32.mrb[24].mxu1  ;;  %v1035_v50 = vld [vmem:[#allocation2 + $0x38] sm:$0xff] }
 0x11a   : > { %1006 = vst.msk [vmem:[#allocation2 + $0x58] sm:$0xff] %vm207_vm2, %v990_v10  ;;  %v1243_v16 = vadd.f32 %v3351_v15, %v1029_v14  ;;  %v1163_v18 = vpop.f32.mrb[25].mxu1  ;;  %v1034_v53 = vld [vmem:[#allocation2 + $0x30] sm:$0xff] }
 0x11b   : > { %1005 = vst.msk [vmem:[#allocation2 + $0x50] sm:$0xff] %vm207_vm2, %v989_v13  ;;  %v778_v19 = vld [vmem:[#allocation2 + $0x68] sm:$0xff]  ;;  %v1242_v20 = vadd.f32 %v1163_v18, %v1028_v17  ;;  %v3377_v21 = vpop.f32.mrb[24].mxu0 }
 0x11c   : > { %1259 = vst.msk [vmem:[#allocation2 + $0x8] sm:$0xff] %vm207_vm2, %v1243_v16  ;;  %v992_v22 = vadd.f32 %v3343_v61, %v778_v19  ;;  %v777_v23 = vld [vmem:[#allocation2 + $0x60] sm:$0xff]  ;;  %v1425_v24 = vpop.f32.mrb[25].mxu0 }
 0x11d   : > { %1258 = vst.msk [vmem:[#allocation2] sm:$0xff] %vm207_vm2, %v1242_v20  ;;  %v991_v25 = vadd.f32 %v960_v0, %v777_v23  ;;  %v3354_v27 = vpop.f32.mrb[26].mxu1  ;;  %v1037_v62 = vld [vmem:[#allocation2 + $0x48] sm:$0xff] }
 0x11e   : > { %1008 = vst.msk [vmem:[#allocation2 + $0x68] sm:$0xff] %vm207_vm2, %v992_v22  ;;  %v1245_v28 = vadd.f32 %v3354_v27, %v1031_v26  ;;  %v1173_v30 = vpop.f32.mrb[27].mxu1  ;;  %v1036_v1 = vld [vmem:[#allocation2 + $0x40] sm:$0xff] }
 0x11f   : > { %1007 = vst.msk [vmem:[#allocation2 + $0x60] sm:$0xff] %vm207_vm2, %v991_v25  ;;  %v780_v31 = vld [vmem:[#allocation2 + $0x78] sm:$0xff]  ;;  %v1244_v32 = vadd.f32 %v1173_v30, %v1030_v29  ;;  %v3380_v33 = vpop.f32.mrb[26].mxu0 }
 0x120   : > { %1261 = vst.msk [vmem:[#allocation2 + $0x18] sm:$0xff] %vm207_vm2, %v1245_v28  ;;  %v994_v34 = vadd.f32 %v3346_v9, %v780_v31  ;;  %v779_v35 = vld [vmem:[#allocation2 + $0x70] sm:$0xff]  ;;  %v1435_v36 = vpop.f32.mrb[27].mxu0 }
 0x121   : > { %1260 = vst.msk [vmem:[#allocation2 + $0x10] sm:$0xff] %vm207_vm2, %v1244_v32  ;;  %v993_v37 = vadd.f32 %v970_v12, %v779_v35  ;;  %v3357_v39 = vpop.f32.mrb[28].mxu1  ;;  %v1039_v10 = vld [vmem:[#allocation2 + $0x58] sm:$0xff] }
 0x122   : > { %1010 = vst.msk [vmem:[#allocation2 + $0x78] sm:$0xff] %vm207_vm2, %v994_v34  ;;  %v1247_v40 = vadd.f32 %v3357_v39, %v1033_v38  ;;  %v1183_v42 = vpop.f32.mrb[29].mxu1  ;;  %v1038_v13 = vld [vmem:[#allocation2 + $0x50] sm:$0xff] }
 0x123   : > { %1009 = vst.msk [vmem:[#allocation2 + $0x70] sm:$0xff] %vm207_vm2, %v993_v37  ;;  %v1246_v43 = vadd.f32 %v1183_v42, %v1032_v41  ;;  %v1291_v44 = vld [vmem:[#allocation2 + $0x8] sm:$0xff]  ;;  %v3383_v45 = vpop.f32.mrb[28].mxu0 }
 0x124   : > { %1263 = vst.msk [vmem:[#allocation2 + $0x28] sm:$0xff] %vm207_vm2, %v1247_v40  ;;  %v1505_v46 = vadd.f32 %v3377_v21, %v1291_v44  ;;  %v1290_v47 = vld [vmem:[#allocation2] sm:$0xff]  ;;  %v1445_v48 = vpop.f32.mrb[29].mxu0 }
 0x125   : > { %1262 = vst.msk [vmem:[#allocation2 + $0x20] sm:$0xff] %vm207_vm2, %v1246_v43  ;;  %v1504_v49 = vadd.f32 %v1425_v24, %v1290_v47  ;;  %v3360_v51 = vpop.f32.mrb[30].mxu1  ;;  %v1041_v22 = vld [vmem:[#allocation2 + $0x68] sm:$0xff] }
 0x126   : > { %1521 = vst.msk [vmem:[#allocation2 + $0x8] sm:$0xff] %vm207_vm2, %v1505_v46  ;;  %v1249_v52 = vadd.f32 %v3360_v51, %v1035_v50  ;;  %v1193_v54 = vpop.f32.mrb[31].mxu1  ;;  %v1040_v25 = vld [vmem:[#allocation2 + $0x60] sm:$0xff] }
 0x127   : > { %1520 = vst.msk [vmem:[#allocation2] sm:$0xff] %vm207_vm2, %v1504_v49  ;;  %v1248_v55 = vadd.f32 %v1193_v54, %v1034_v53  ;;  %v1293_v56 = vld [vmem:[#allocation2 + $0x18] sm:$0xff]  ;;  %v3386_v57 = vpop.f32.mrb[30].mxu0 }
 0x128   : > { %1265 = vst.msk [vmem:[#allocation2 + $0x38] sm:$0xff] %vm207_vm2, %v1249_v52  ;;  %v1507_v58 = vadd.f32 %v3380_v33, %v1293_v56  ;;  %v1292_v59 = vld [vmem:[#allocation2 + $0x10] sm:$0xff]  ;;  %v1455_v60 = vpop.f32.mrb[31].mxu0 }
 0x129   : > { %1264 = vst.msk [vmem:[#allocation2 + $0x30] sm:$0xff] %vm207_vm2, %v1248_v55  ;;  %v1506_v61 = vadd.f32 %v1435_v36, %v1292_v59  ;;  %v3363_v63 = vpop.f32.mrb[32].mxu1  ;;  %v1043_v34 = vld [vmem:[#allocation2 + $0x78] sm:$0xff] }
 0x12a   : > { %1523 = vst.msk [vmem:[#allocation2 + $0x18] sm:$0xff] %vm207_vm2, %v1507_v58  ;;  %v1251_v0 = vadd.f32 %v3363_v63, %v1037_v62  ;;  %v1203_v2 = vpop.f32.mrb[33].mxu1  ;;  %v1042_v37 = vld [vmem:[#allocation2 + $0x70] sm:$0xff] }
 0x12b   : > { %1522 = vst.msk [vmem:[#allocation2 + $0x10] sm:$0xff] %vm207_vm2, %v1506_v61  ;;  %v1250_v3 = vadd.f32 %v1203_v2, %v1036_v1  ;;  %v1295_v4 = vld [vmem:[#allocation2 + $0x28] sm:$0xff]  ;;  %v3389_v5 = vpop.f32.mrb[32].mxu0 }
 0x12c   : > { %1267 = vst.msk [vmem:[#allocation2 + $0x48] sm:$0xff] %vm207_vm2, %v1251_v0  ;;  %v1509_v6 = vadd.f32 %v3383_v45, %v1295_v4  ;;  %v1294_v7 = vld [vmem:[#allocation2 + $0x20] sm:$0xff]  ;;  %v1465_v8 = vpop.f32.mrb[33].mxu0 }
 0x12d   : > { %1266 = vst.msk [vmem:[#allocation2 + $0x40] sm:$0xff] %vm207_vm2, %v1250_v3  ;;  %v1508_v9 = vadd.f32 %v1445_v48, %v1294_v7  ;;  %v3366_v11 = vpop.f32.mrb[34].mxu1  ;;  %v1553_v46 = vld [vmem:[#allocation2 + $0x8] sm:$0xff] }
 0x12e   : > { %1525 = vst.msk [vmem:[#allocation2 + $0x28] sm:$0xff] %vm207_vm2, %v1509_v6  ;;  %v1253_v12 = vadd.f32 %v3366_v11, %v1039_v10  ;;  %v1213_v14 = vpop.f32.mrb[35].mxu1  ;;  %v1552_v49 = vld [vmem:[#allocation2] sm:$0xff] }
 0x12f   : > { %1524 = vst.msk [vmem:[#allocation2 + $0x20] sm:$0xff] %vm207_vm2, %v1508_v9  ;;  %v1252_v15 = vadd.f32 %v1213_v14, %v1038_v13  ;;  %v1297_v16 = vld [vmem:[#allocation2 + $0x38] sm:$0xff]  ;;  %v3392_v17 = vpop.f32.mrb[34].mxu0 }
 0x130   : > { %1269 = vst.msk [vmem:[#allocation2 + $0x58] sm:$0xff] %vm207_vm2, %v1253_v12  ;;  %v1511_v18 = vadd.f32 %v3386_v57, %v1297_v16  ;;  %v1296_v19 = vld [vmem:[#allocation2 + $0x30] sm:$0xff]  ;;  %v1475_v20 = vpop.f32.mrb[35].mxu0 }
 0x131   : > { %1268 = vst.msk [vmem:[#allocation2 + $0x50] sm:$0xff] %vm207_vm2, %v1252_v15  ;;  %v1510_v21 = vadd.f32 %v1455_v60, %v1296_v19  ;;  %v3369_v23 = vpop.f32.mrb[36].mxu1  ;;  %v1555_v58 = vld [vmem:[#allocation2 + $0x18] sm:$0xff] }
 0x132   : > { %1527 = vst.msk [vmem:[#allocation2 + $0x38] sm:$0xff] %vm207_vm2, %v1511_v18  ;;  %v1255_v24 = vadd.f32 %v3369_v23, %v1041_v22  ;;  %v1223_v26 = vpop.f32.mrb[37].mxu1  ;;  %v1554_v61 = vld [vmem:[#allocation2 + $0x10] sm:$0xff] }
 0x133   : > { %1526 = vst.msk [vmem:[#allocation2 + $0x30] sm:$0xff] %vm207_vm2, %v1510_v21  ;;  %v1254_v27 = vadd.f32 %v1223_v26, %v1040_v25  ;;  %v1299_v28 = vld [vmem:[#allocation2 + $0x48] sm:$0xff]  ;;  %v3395_v29 = vpop.f32.mrb[36].mxu0 }
 0x134   : > { %1271 = vst.msk [vmem:[#allocation2 + $0x68] sm:$0xff] %vm207_vm2, %v1255_v24  ;;  %v1513_v30 = vadd.f32 %v3389_v5, %v1299_v28  ;;  %v1298_v31 = vld [vmem:[#allocation2 + $0x40] sm:$0xff]  ;;  %v1485_v32 = vpop.f32.mrb[37].mxu0 }
 0x135   : > { %1270 = vst.msk [vmem:[#allocation2 + $0x60] sm:$0xff] %vm207_vm2, %v1254_v27  ;;  %v1512_v33 = vadd.f32 %v1465_v8, %v1298_v31  ;;  %v3372_v35 = vpop.f32.mrb[38].mxu1  ;;  %v1557_v6 = vld [vmem:[#allocation2 + $0x28] sm:$0xff] }
 0x136   : > { %1529 = vst.msk [vmem:[#allocation2 + $0x48] sm:$0xff] %vm207_vm2, %v1513_v30  ;;  %v1257_v36 = vadd.f32 %v3372_v35, %v1043_v34  ;;  %v1233_v38 = vpop.f32.mrb[39].mxu1  ;;  %v1556_v9 = vld [vmem:[#allocation2 + $0x20] sm:$0xff] }
 0x137   : > { %1528 = vst.msk [vmem:[#allocation2 + $0x40] sm:$0xff] %vm207_vm2, %v1512_v33  ;;  %v1256_v39 = vadd.f32 %v1233_v38, %v1042_v37  ;;  %v1301_v40 = vld [vmem:[#allocation2 + $0x58] sm:$0xff]  ;;  %v3398_v41 = vpop.f32.mrb[38].mxu0 }
 0x138   : > { %1273 = vst.msk [vmem:[#allocation2 + $0x78] sm:$0xff] %vm207_vm2, %v1257_v36  ;;  %v1515_v42 = vadd.f32 %v3392_v17, %v1301_v40  ;;  %v1300_v43 = vld [vmem:[#allocation2 + $0x50] sm:$0xff]  ;;  %v1495_v44 = vpop.f32.mrb[39].mxu0 }
 0x139   : > { %1272 = vst.msk [vmem:[#allocation2 + $0x70] sm:$0xff] %vm207_vm2, %v1256_v39  ;;  %v1514_v45 = vadd.f32 %v1475_v20, %v1300_v43  ;;  %v3403_v47 = vpop.f32.mrb[40].mxu1  ;;  %v1559_v18 = vld [vmem:[#allocation2 + $0x38] sm:$0xff] }
 0x13a   : > { %1531 = vst.msk [vmem:[#allocation2 + $0x58] sm:$0xff] %vm207_vm2, %v1515_v42  ;;  %v1767_v48 = vadd.f32 %v3403_v47, %v1553_v46  ;;  %v1687_v50 = vpop.f32.mrb[41].mxu1  ;;  %v1558_v21 = vld [vmem:[#allocation2 + $0x30] sm:$0xff] }
 0x13b   : > { %1530 = vst.msk [vmem:[#allocation2 + $0x50] sm:$0xff] %vm207_vm2, %v1514_v45  ;;  %v1303_v51 = vld [vmem:[#allocation2 + $0x68] sm:$0xff]  ;;  %v1766_v52 = vadd.f32 %v1687_v50, %v1552_v49  ;;  %v3429_v53 = vpop.f32.mrb[40].mxu0 }
 0x13c   : > { %1783 = vst.msk [vmem:[#allocation2 + $0x8] sm:$0xff] %vm207_vm2, %v1767_v48  ;;  %v1517_v54 = vadd.f32 %v3395_v29, %v1303_v51  ;;  %v1302_v55 = vld [vmem:[#allocation2 + $0x60] sm:$0xff]  ;;  %v1950_v56 = vpop.f32.mrb[41].mxu0 }
 0x13d   : > { %1782 = vst.msk [vmem:[#allocation2] sm:$0xff] %vm207_vm2, %v1766_v52  ;;  %v1516_v57 = vadd.f32 %v1485_v32, %v1302_v55  ;;  %v3406_v59 = vpop.f32.mrb[42].mxu1  ;;  %v1561_v30 = vld [vmem:[#allocation2 + $0x48] sm:$0xff] }
 0x13e   : > { %1533 = vst.msk [vmem:[#allocation2 + $0x68] sm:$0xff] %vm207_vm2, %v1517_v54  ;;  %v1769_v60 = vadd.f32 %v3406_v59, %v1555_v58  ;;  %v1697_v62 = vpop.f32.mrb[43].mxu1  ;;  %v1560_v33 = vld [vmem:[#allocation2 + $0x40] sm:$0xff] }
 0x13f   : > { %1532 = vst.msk [vmem:[#allocation2 + $0x60] sm:$0xff] %vm207_vm2, %v1516_v57  ;;  %v1305_v63 = vld [vmem:[#allocation2 + $0x78] sm:$0xff]  ;;  %v1768_v0 = vadd.f32 %v1697_v62, %v1554_v61  ;;  %v3432_v1 = vpop.f32.mrb[42].mxu0 }
 0x140   : > { %1785 = vst.msk [vmem:[#allocation2 + $0x18] sm:$0xff] %vm207_vm2, %v1769_v60  ;;  %v1519_v2 = vadd.f32 %v3398_v41, %v1305_v63  ;;  %v1304_v3 = vld [vmem:[#allocation2 + $0x70] sm:$0xff]  ;;  %v1960_v4 = vpop.f32.mrb[43].mxu0 }
 0x141   : > { %1784 = vst.msk [vmem:[#allocation2 + $0x10] sm:$0xff] %vm207_vm2, %v1768_v0  ;;  %v1518_v5 = vadd.f32 %v1495_v44, %v1304_v3  ;;  %v3409_v7 = vpop.f32.mrb[44].mxu1  ;;  %v1563_v42 = vld [vmem:[#allocation2 + $0x58] sm:$0xff] }
 0x142   : > { %1535 = vst.msk [vmem:[#allocation2 + $0x78] sm:$0xff] %vm207_vm2, %v1519_v2  ;;  %v1771_v8 = vadd.f32 %v3409_v7, %v1557_v6  ;;  %v1707_v10 = vpop.f32.mrb[45].mxu1  ;;  %v1562_v45 = vld [vmem:[#allocation2 + $0x50] sm:$0xff] }
 0x143   : > { %1534 = vst.msk [vmem:[#allocation2 + $0x70] sm:$0xff] %vm207_vm2, %v1518_v5  ;;  %v1770_v11 = vadd.f32 %v1707_v10, %v1556_v9  ;;  %v1816_v12 = vld [vmem:[#allocation2 + $0x8] sm:$0xff]  ;;  %v3435_v13 = vpop.f32.mrb[44].mxu0 }
 0x144   : > { %1787 = vst.msk [vmem:[#allocation2 + $0x28] sm:$0xff] %vm207_vm2, %v1771_v8  ;;  %v2030_v14 = vadd.f32 %v3429_v53, %v1816_v12  ;;  %v1815_v15 = vld [vmem:[#allocation2] sm:$0xff]  ;;  %v1970_v16 = vpop.f32.mrb[45].mxu0 }
 0x145   : > { %1786 = vst.msk [vmem:[#allocation2 + $0x20] sm:$0xff] %vm207_vm2, %v1770_v11  ;;  %v2029_v17 = vadd.f32 %v1950_v56, %v1815_v15  ;;  %v3412_v19 = vpop.f32.mrb[46].mxu1  ;;  %v1565_v54 = vld [vmem:[#allocation2 + $0x68] sm:$0xff] }
 0x146   : > { %2046 = vst.msk [vmem:[#allocation2 + $0x8] sm:$0xff] %vm207_vm2, %v2030_v14  ;;  %v1773_v20 = vadd.f32 %v3412_v19, %v1559_v18  ;;  %v1717_v22 = vpop.f32.mrb[47].mxu1  ;;  %v1564_v57 = vld [vmem:[#allocation2 + $0x60] sm:$0xff] }
 0x147   : > { %2045 = vst.msk [vmem:[#allocation2] sm:$0xff] %vm207_vm2, %v2029_v17  ;;  %v1772_v23 = vadd.f32 %v1717_v22, %v1558_v21  ;;  %v1818_v24 = vld [vmem:[#allocation2 + $0x18] sm:$0xff]  ;;  %v3438_v25 = vpop.f32.mrb[46].mxu0 }
 0x148   : > { %1789 = vst.msk [vmem:[#allocation2 + $0x38] sm:$0xff] %vm207_vm2, %v1773_v20  ;;  %v2032_v26 = vadd.f32 %v3432_v1, %v1818_v24  ;;  %v1817_v27 = vld [vmem:[#allocation2 + $0x10] sm:$0xff]  ;;  %v1980_v28 = vpop.f32.mrb[47].mxu0 }
 0x149   : > { %1788 = vst.msk [vmem:[#allocation2 + $0x30] sm:$0xff] %vm207_vm2, %v1772_v23  ;;  %v2031_v29 = vadd.f32 %v1960_v4, %v1817_v27  ;;  %v3415_v31 = vpop.f32.mrb[48].mxu1  ;;  %v1567_v2 = vld [vmem:[#allocation2 + $0x78] sm:$0xff] }
 0x14a   : > { %2048 = vst.msk [vmem:[#allocation2 + $0x18] sm:$0xff] %vm207_vm2, %v2032_v26  ;;  %v1775_v32 = vadd.f32 %v3415_v31, %v1561_v30  ;;  %v1727_v34 = vpop.f32.mrb[49].mxu1  ;;  %v1566_v5 = vld [vmem:[#allocation2 + $0x70] sm:$0xff] }
 0x14b   : > { %2047 = vst.msk [vmem:[#allocation2 + $0x10] sm:$0xff] %vm207_vm2, %v2031_v29  ;;  %v1774_v35 = vadd.f32 %v1727_v34, %v1560_v33  ;;  %v1820_v36 = vld [vmem:[#allocation2 + $0x28] sm:$0xff]  ;;  %v3441_v37 = vpop.f32.mrb[48].mxu0 }
 0x14c   : > { %1791 = vst.msk [vmem:[#allocation2 + $0x48] sm:$0xff] %vm207_vm2, %v1775_v32  ;;  %v2034_v38 = vadd.f32 %v3435_v13, %v1820_v36  ;;  %v1819_v39 = vld [vmem:[#allocation2 + $0x20] sm:$0xff]  ;;  %v1990_v40 = vpop.f32.mrb[49].mxu0 }
 0x14d   : > { %1790 = vst.msk [vmem:[#allocation2 + $0x40] sm:$0xff] %vm207_vm2, %v1774_v35  ;;  %v2033_v41 = vadd.f32 %v1970_v16, %v1819_v39  ;;  %v3418_v43 = vpop.f32.mrb[50].mxu1  ;;  %v2078_v14 = vld [vmem:[#allocation2 + $0x8] sm:$0xff] }
 0x14e   : > { %2050 = vst.msk [vmem:[#allocation2 + $0x28] sm:$0xff] %vm207_vm2, %v2034_v38  ;;  %v1777_v44 = vadd.f32 %v3418_v43, %v1563_v42  ;;  %v1737_v46 = vpop.f32.mrb[51].mxu1  ;;  %v2077_v17 = vld [vmem:[#allocation2] sm:$0xff] }
 0x14f   : > { %2049 = vst.msk [vmem:[#allocation2 + $0x20] sm:$0xff] %vm207_vm2, %v2033_v41  ;;  %v1776_v47 = vadd.f32 %v1737_v46, %v1562_v45  ;;  %v1822_v48 = vld [vmem:[#allocation2 + $0x38] sm:$0xff]  ;;  %v3444_v49 = vpop.f32.mrb[50].mxu0 }
 0x150   : > { %1793 = vst.msk [vmem:[#allocation2 + $0x58] sm:$0xff] %vm207_vm2, %v1777_v44  ;;  %v2036_v50 = vadd.f32 %v3438_v25, %v1822_v48  ;;  %v1821_v51 = vld [vmem:[#allocation2 + $0x30] sm:$0xff]  ;;  %v2000_v52 = vpop.f32.mrb[51].mxu0 }
 0x151   : > { %1792 = vst.msk [vmem:[#allocation2 + $0x50] sm:$0xff] %vm207_vm2, %v1776_v47  ;;  %v2035_v53 = vadd.f32 %v1980_v28, %v1821_v51  ;;  %v3421_v55 = vpop.f32.mrb[52].mxu1  ;;  %v2080_v26 = vld [vmem:[#allocation2 + $0x18] sm:$0xff] }
 0x152   : > { %2052 = vst.msk [vmem:[#allocation2 + $0x38] sm:$0xff] %vm207_vm2, %v2036_v50  ;;  %v1779_v56 = vadd.f32 %v3421_v55, %v1565_v54  ;;  %v1747_v58 = vpop.f32.mrb[53].mxu1  ;;  %v2079_v29 = vld [vmem:[#allocation2 + $0x10] sm:$0xff] }
 0x153   : > { %2051 = vst.msk [vmem:[#allocation2 + $0x30] sm:$0xff] %vm207_vm2, %v2035_v53  ;;  %v1778_v59 = vadd.f32 %v1747_v58, %v1564_v57  ;;  %v1824_v60 = vld [vmem:[#allocation2 + $0x48] sm:$0xff]  ;;  %v3447_v61 = vpop.f32.mrb[52].mxu0 }
 0x154   : > { %1795 = vst.msk [vmem:[#allocation2 + $0x68] sm:$0xff] %vm207_vm2, %v1779_v56  ;;  %v2038_v62 = vadd.f32 %v3441_v37, %v1824_v60  ;;  %v1823_v63 = vld [vmem:[#allocation2 + $0x40] sm:$0xff]  ;;  %v2010_v0 = vpop.f32.mrb[53].mxu0 }
 0x155   : > { %1794 = vst.msk [vmem:[#allocation2 + $0x60] sm:$0xff] %vm207_vm2, %v1778_v59  ;;  %v2037_v1 = vadd.f32 %v1990_v40, %v1823_v63  ;;  %v3424_v3 = vpop.f32.mrb[54].mxu1  ;;  %v2082_v38 = vld [vmem:[#allocation2 + $0x28] sm:$0xff] }
 0x156   : > { %2054 = vst.msk [vmem:[#allocation2 + $0x48] sm:$0xff] %vm207_vm2, %v2038_v62  ;;  %v1781_v4 = vadd.f32 %v3424_v3, %v1567_v2  ;;  %v1757_v6 = vpop.f32.mrb[55].mxu1  ;;  %v2081_v41 = vld [vmem:[#allocation2 + $0x20] sm:$0xff] }
 0x157   : > { %2053 = vst.msk [vmem:[#allocation2 + $0x40] sm:$0xff] %vm207_vm2, %v2037_v1  ;;  %v1780_v7 = vadd.f32 %v1757_v6, %v1566_v5  ;;  %v1826_v8 = vld [vmem:[#allocation2 + $0x58] sm:$0xff]  ;;  %v3450_v9 = vpop.f32.mrb[54].mxu0  ;;  %v4323_v3 = vld [vmem:[%s4481_s2] ss:$0 sm:$0xff] }
 0x158   : > { %1797 = vst.msk [vmem:[#allocation2 + $0x78] sm:$0xff] %vm207_vm2, %v1781_v4  ;;  %v2040_v10 = vadd.f32 %v3444_v49, %v1826_v8  ;;  %v1825_v11 = vld [vmem:[#allocation2 + $0x50] sm:$0xff]  ;;  %v2020_v12 = vpop.f32.mrb[55].mxu0 }
 0x159   : > { %1796 = vst.msk [vmem:[#allocation2 + $0x70] sm:$0xff] %vm207_vm2, %v1780_v7  ;;  %v2039_v13 = vadd.f32 %v2000_v52, %v1825_v11  ;;  %v3455_v15 = vpop.f32.mrb[56].mxu1  ;;  %v2084_v50 = vld [vmem:[#allocation2 + $0x38] sm:$0xff] }
 0x15a   : > { %2056 = vst.msk [vmem:[#allocation2 + $0x58] sm:$0xff] %vm207_vm2, %v2040_v10  ;;  %v2292_v16 = vadd.f32 %v3455_v15, %v2078_v14  ;;  %v2212_v18 = vpop.f32.mrb[57].mxu1  ;;  %v2083_v53 = vld [vmem:[#allocation2 + $0x30] sm:$0xff] }
 0x15b   : > { %2055 = vst.msk [vmem:[#allocation2 + $0x50] sm:$0xff] %vm207_vm2, %v2039_v13  ;;  %v1828_v19 = vld [vmem:[#allocation2 + $0x68] sm:$0xff]  ;;  %v2291_v20 = vadd.f32 %v2212_v18, %v2077_v17  ;;  %v3481_v21 = vpop.f32.mrb[56].mxu0 }
 0x15c   : > { %2308 = vst.msk [vmem:[#allocation2 + $0x8] sm:$0xff] %vm207_vm2, %v2292_v16  ;;  %v2042_v22 = vadd.f32 %v3447_v61, %v1828_v19  ;;  %v1827_v23 = vld [vmem:[#allocation2 + $0x60] sm:$0xff]  ;;  %v2474_v24 = vpop.f32.mrb[57].mxu0 }
 0x15d   : > { %2307 = vst.msk [vmem:[#allocation2] sm:$0xff] %vm207_vm2, %v2291_v20  ;;  %v2041_v25 = vadd.f32 %v2010_v0, %v1827_v23  ;;  %v3458_v27 = vpop.f32.mrb[58].mxu1  ;;  %v2086_v62 = vld [vmem:[#allocation2 + $0x48] sm:$0xff] }
 0x15e   : > { %2058 = vst.msk [vmem:[#allocation2 + $0x68] sm:$0xff] %vm207_vm2, %v2042_v22  ;;  %v2294_v28 = vadd.f32 %v3458_v27, %v2080_v26  ;;  %v2222_v30 = vpop.f32.mrb[59].mxu1  ;;  %v2085_v1 = vld [vmem:[#allocation2 + $0x40] sm:$0xff] }
 0x15f   : > { %2057 = vst.msk [vmem:[#allocation2 + $0x60] sm:$0xff] %vm207_vm2, %v2041_v25  ;;  %v1830_v31 = vld [vmem:[#allocation2 + $0x78] sm:$0xff]  ;;  %v2293_v32 = vadd.f32 %v2222_v30, %v2079_v29  ;;  %v3484_v33 = vpop.f32.mrb[58].mxu0 }
 0x160   : > { %2310 = vst.msk [vmem:[#allocation2 + $0x18] sm:$0xff] %vm207_vm2, %v2294_v28  ;;  %v2044_v34 = vadd.f32 %v3450_v9, %v1830_v31  ;;  %v1829_v35 = vld [vmem:[#allocation2 + $0x70] sm:$0xff]  ;;  %v2484_v36 = vpop.f32.mrb[59].mxu0 }
 0x161   : > { %2309 = vst.msk [vmem:[#allocation2 + $0x10] sm:$0xff] %vm207_vm2, %v2293_v32  ;;  %v2043_v37 = vadd.f32 %v2020_v12, %v1829_v35  ;;  %v3461_v39 = vpop.f32.mrb[60].mxu1  ;;  %v2088_v12 = vld [vmem:[#allocation2 + $0x58] sm:$0xff] }
 0x162   : > { %2060 = vst.msk [vmem:[#allocation2 + $0x78] sm:$0xff] %vm207_vm2, %v2044_v34  ;;  %v2296_v40 = vadd.f32 %v3461_v39, %v2082_v38  ;;  %v2232_v42 = vpop.f32.mrb[61].mxu1  ;;  %v2087_v17 = vld [vmem:[#allocation2 + $0x50] sm:$0xff] }
 0x163   : > { %2059 = vst.msk [vmem:[#allocation2 + $0x70] sm:$0xff] %vm207_vm2, %v2043_v37  ;;  %v2295_v43 = vadd.f32 %v2232_v42, %v2081_v41  ;;  %v2340_v44 = vld [vmem:[#allocation2 + $0x8] sm:$0xff]  ;;  %v3487_v45 = vpop.f32.mrb[60].mxu0 }
 0x164   : > { %2312 = vst.msk [vmem:[#allocation2 + $0x28] sm:$0xff] %vm207_vm2, %v2296_v40  ;;  %v2554_v46 = vadd.f32 %v3481_v21, %v2340_v44  ;;  %v2339_v47 = vld [vmem:[#allocation2] sm:$0xff]  ;;  %v2494_v48 = vpop.f32.mrb[61].mxu0 }
 0x165   : > { %2311 = vst.msk [vmem:[#allocation2 + $0x20] sm:$0xff] %vm207_vm2, %v2295_v43  ;;  %v2553_v49 = vadd.f32 %v2474_v24, %v2339_v47  ;;  %v3464_v51 = vpop.f32.mrb[62].mxu1  ;;  %v2090_v30 = vld [vmem:[#allocation2 + $0x68] sm:$0xff] }
 0x166   : > { %2570 = vst.msk [vmem:[#allocation2 + $0x8] sm:$0xff] %vm207_vm2, %v2554_v46  ;;  %v2298_v52 = vadd.f32 %v3464_v51, %v2084_v50  ;;  %v2242_v54 = vpop.f32.mrb[63].mxu1  ;;  %v2089_v35 = vld [vmem:[#allocation2 + $0x60] sm:$0xff] }
 0x167   : > { %2569 = vst.msk [vmem:[#allocation2] sm:$0xff] %vm207_vm2, %v2553_v49  ;;  %v2297_v55 = vadd.f32 %v2242_v54, %v2083_v53  ;;  %v2342_v56 = vld [vmem:[#allocation2 + $0x18] sm:$0xff]  ;;  %v3490_v57 = vpop.f32.mrb[62].mxu0 }
 0x168   : > { %2314 = vst.msk [vmem:[#allocation2 + $0x38] sm:$0xff] %vm207_vm2, %v2298_v52  ;;  %v2556_v58 = vadd.f32 %v3484_v33, %v2342_v56  ;;  %v2341_v59 = vld [vmem:[#allocation2 + $0x10] sm:$0xff]  ;;  %v2504_v60 = vpop.f32.mrb[63].mxu0 }
 0x169   : > { %2313 = vst.msk [vmem:[#allocation2 + $0x30] sm:$0xff] %vm207_vm2, %v2297_v55  ;;  %v2555_v61 = vadd.f32 %v2484_v36, %v2341_v59  ;;  %v3467_v63 = vpop.f32.mrb[64].mxu1 }
 0x16a   : > { %2572 = vst.msk [vmem:[#allocation2 + $0x18] sm:$0xff] %vm207_vm2, %v2556_v58  ;;  %v2300_v0 = vadd.f32 %v3467_v63, %v2086_v62  ;;  %v2252_v2 = vpop.f32.mrb[65].mxu1  ;;  %v2091_v53 = vld [vmem:[#allocation2 + $0x70] sm:$0xff] }
 0x16b   : > { %2571 = vst.msk [vmem:[#allocation2 + $0x10] sm:$0xff] %vm207_vm2, %v2555_v61  ;;  %v2299_v4 = vadd.f32 %v2252_v2, %v2085_v1  ;;  %v2344_v5 = vld [vmem:[#allocation2 + $0x28] sm:$0xff]  ;;  %v3493_v6 = vpop.f32.mrb[64].mxu0 }
 0x16c   : > { %2316 = vst.msk [vmem:[#allocation2 + $0x48] sm:$0xff] %vm207_vm2, %v2300_v0  ;;  %v2558_v7 = vadd.f32 %v3487_v45, %v2344_v5  ;;  %v2343_v8 = vld [vmem:[#allocation2 + $0x20] sm:$0xff]  ;;  %v2514_v9 = vpop.f32.mrb[65].mxu0 }
 0x16d   : > { %v2586_v10 = vld [vmem:[#allocation2 + $0x8] sm:$0xff]  ;;  %2315 = vst.msk [vmem:[#allocation2 + $0x40] sm:$0xff] %vm207_vm2, %v2299_v4  ;;  %v2557_v11 = vadd.f32 %v2494_v48, %v2343_v8  ;;  %v3470_v13 = vpop.f32.mrb[66].mxu1  ;;  %v2092_v48 = vld [vmem:[#allocation2 + $0x78] sm:$0xff] }
 0x16e   : > { %v4329_v14 = vadd.f32 %v4323_v3, %v2586_v10  ;;  %v2585_v15 = vld [vmem:[#allocation2] sm:$0xff]  ;;  %2574 = vst.msk [vmem:[#allocation2 + $0x28] sm:$0xff] %vm207_vm2, %v2558_v7  ;;  %v2302_v16 = vadd.f32 %v3470_v13, %v2088_v12  ;;  %v2262_v18 = vpop.f32.mrb[67].mxu1 }
 0x16f   : > { %v4333_v19 = vadd.f32 %v4323_v3, %v2585_v15  ;;  %2573 = vst.msk [vmem:[#allocation2 + $0x20] sm:$0xff] %vm207_vm2, %v2557_v11  ;;  %v2301_v20 = vadd.f32 %v2262_v18, %v2087_v17  ;;  %v2346_v21 = vld [vmem:[#allocation2 + $0x38] sm:$0xff]  ;;  %v3496_v22 = vpop.f32.mrb[66].mxu0 }
 0x170   : > { %v3098_v23 = vmul.f32 -1.442695, %v4329_v14  ;;  %2318 = vst.msk [vmem:[#allocation2 + $0x58] sm:$0xff] %vm207_vm2, %v2302_v16  ;;  %v2560_v24 = vadd.f32 %v3490_v57, %v2346_v21  ;;  %v2345_v25 = vld [vmem:[#allocation2 + $0x30] sm:$0xff]  ;;  %v2524_v26 = vpop.f32.mrb[67].mxu0 }
 0x171   : > { %v3097_v27 = vmul.f32 -1.442695, %v4333_v19  ;;  %v2588_v28 = vld [vmem:[#allocation2 + $0x18] sm:$0xff]  ;;  %2317 = vst.msk [vmem:[#allocation2 + $0x50] sm:$0xff] %vm207_vm2, %v2301_v20  ;;  %v2559_v29 = vadd.f32 %v2504_v60, %v2345_v25  ;;  %v3473_v31 = vpop.f32.mrb[68].mxu1 }
 0x172   : > { %3547 = vpow2.f32 %v3098_v23  ;;  %v4341_v32 = vadd.f32 %v4323_v3, %v2588_v28  ;;  %v2587_v33 = vld [vmem:[#allocation2 + $0x10] sm:$0xff]  ;;  %2576 = vst.msk [vmem:[#allocation2 + $0x38] sm:$0xff] %vm207_vm2, %v2560_v24  ;;  %v2304_v34 = vadd.f32 %v3473_v31, %v2090_v30  ;;  %v2272_v36 = vpop.f32.mrb[69].mxu1 }
 0x173   : > { %3549 = vpow2.f32 %v3097_v27  ;;  %v4345_v37 = vadd.f32 %v4323_v3, %v2587_v33  ;;  %2575 = vst.msk [vmem:[#allocation2 + $0x30] sm:$0xff] %vm207_vm2, %v2559_v29  ;;  %v2303_v38 = vadd.f32 %v2272_v36, %v2089_v35  ;;  %v2348_v39 = vld [vmem:[#allocation2 + $0x48] sm:$0xff]  ;;  %v3499_v40 = vpop.f32.mrb[68].mxu0 }
 0x174   : > { %v3100_v41 = vmul.f32 -1.442695, %v4341_v32  ;;  %2320 = vst.msk [vmem:[#allocation2 + $0x68] sm:$0xff] %vm207_vm2, %v2304_v34  ;;  %v2562_v42 = vadd.f32 %v3493_v6, %v2348_v39  ;;  %v2347_v43 = vld [vmem:[#allocation2 + $0x40] sm:$0xff]  ;;  %v2534_v44 = vpop.f32.mrb[69].mxu0 }
 0x175   : > { %v3099_v45 = vmul.f32 -1.442695, %v4345_v37  ;;  %v2590_v46 = vld [vmem:[#allocation2 + $0x28] sm:$0xff]  ;;  %2319 = vst.msk [vmem:[#allocation2 + $0x60] sm:$0xff] %vm207_vm2, %v2303_v38  ;;  %v2561_v47 = vadd.f32 %v2514_v9, %v2347_v43  ;;  %v3476_v49 = vpop.f32.mrb[70].mxu1 }
 0x176   : > { %3551 = vpow2.f32 %v3100_v41  ;;  %v4353_v50 = vadd.f32 %v4323_v3, %v2590_v46  ;;  %v2589_v51 = vld [vmem:[#allocation2 + $0x20] sm:$0xff]  ;;  %2578 = vst.msk [vmem:[#allocation2 + $0x48] sm:$0xff] %vm207_vm2, %v2562_v42  ;;  %v2306_v52 = vadd.f32 %v3476_v49, %v2092_v48  ;;  %v2282_v54 = vpop.f32.mrb[71].mxu1 }
 0x177   : > { %3553 = vpow2.f32 %v3099_v45  ;;  %v4357_v55 = vadd.f32 %v4323_v3, %v2589_v51  ;;  %2577 = vst.msk [vmem:[#allocation2 + $0x40] sm:$0xff] %vm207_vm2, %v2561_v47  ;;  %v2305_v56 = vadd.f32 %v2282_v54, %v2091_v53  ;;  %v2350_v57 = vld [vmem:[#allocation2 + $0x58] sm:$0xff]  ;;  %v3502_v58 = vpop.f32.mrb[70].mxu0 }
 0x178   : > { %v3102_v59 = vmul.f32 -1.442695, %v4353_v50  ;;  %2322 = vst.msk [vmem:[#allocation2 + $0x78] sm:$0xff] %vm207_vm2, %v2306_v52  ;;  %v2564_v60 = vadd.f32 %v3496_v22, %v2350_v57  ;;  %v2349_v61 = vld [vmem:[#allocation2 + $0x50] sm:$0xff]  ;;  %v2544_v62 = vpop.f32.mrb[71].mxu0 }
 0x179   : > { %v3101_v63 = vmul.f32 -1.442695, %v4357_v55  ;;  %v2592_v0 = vld [vmem:[#allocation2 + $0x38] sm:$0xff]  ;;  %2321 = vst.msk [vmem:[#allocation2 + $0x70] sm:$0xff] %vm207_vm2, %v2305_v56  ;;  %v2563_v1 = vadd.f32 %v2524_v26, %v2349_v61 }
 0x17a   : > { %3555 = vpow2.f32 %v3102_v59  ;;  %v4365_v2 = vadd.f32 %v4323_v3, %v2592_v0  ;;  %v2591_v4 = vld [vmem:[#allocation2 + $0x30] sm:$0xff]  ;;  %2580 = vst.msk [vmem:[#allocation2 + $0x58] sm:$0xff] %vm207_vm2, %v2564_v60 }
 0x17b   : > { %3557 = vpow2.f32 %v3101_v63  ;;  %v4369_v5 = vadd.f32 %v4323_v3, %v2591_v4  ;;  %2579 = vst.msk [vmem:[#allocation2 + $0x50] sm:$0xff] %vm207_vm2, %v2563_v1  ;;  %v2352_v6 = vld [vmem:[#allocation2 + $0x68] sm:$0xff] }
 0x17c   : > { %v3548_v7 = vpop.eup %3547  ;;  %v3104_v8 = vmul.f32 -1.442695, %v4365_v2  ;;  %v2566_v9 = vadd.f32 %v3499_v40, %v2352_v6  ;;  %v2351_v10 = vld [vmem:[#allocation2 + $0x60] sm:$0xff] }
 0x17d   : > { %v3550_v11 = vpop.eup %3549  ;;  %v2673_v12 = vadd.f32 1.0, %v3548_v7  ;;  %v3103_v13 = vmul.f32 -1.442695, %v4369_v5  ;;  %v2594_v15 = vld [vmem:[#allocation2 + $0x48] sm:$0xff]  ;;  %v2565_v16 = vadd.f32 %v2534_v44, %v2351_v10 }
 0x17e   : > { %v2672_v17 = vadd.f32 1.0, %v3550_v11  ;;  %3559 = vpow2.f32 %v3104_v8  ;;  %v4375_v18 = vadd.f32 %v4323_v3, %v2594_v15  ;;  %v2593_v20 = vld [vmem:[#allocation2 + $0x40] sm:$0xff]  ;;  %2582 = vst.msk [vmem:[#allocation2 + $0x68] sm:$0xff] %vm207_vm2, %v2566_v9 }
 0x17f   : > { %3561 = vrcp.f32 %v2673_v12  ;;  %v4379_v21 = vadd.f32 %v4323_v3, %v2593_v20  ;;  %2581 = vst.msk [vmem:[#allocation2 + $0x60] sm:$0xff] %vm207_vm2, %v2565_v16  ;;  %v2354_v22 = vld [vmem:[#allocation2 + $0x78] sm:$0xff] }
 0x180   : > { %v3552_v23 = vpop.eup %3551  ;;  %3563 = vrcp.f32 %v2672_v17  ;;  %v3106_v24 = vmul.f32 -1.442695, %v4375_v18  ;;  %v2568_v25 = vadd.f32 %v3502_v58, %v2354_v22  ;;  %v2353_v26 = vld [vmem:[#allocation2 + $0x70] sm:$0xff] }
 0x181   : > { %v3554_v27 = vpop.eup %3553  ;;  %v2675_v28 = vadd.f32 1.0, %v3552_v23  ;;  %3565 = vpow2.f32 %v3103_v13  ;;  %v3105_v29 = vmul.f32 -1.442695, %v4379_v21  ;;  %v2596_v30 = vld [vmem:[#allocation2 + $0x58] sm:$0xff]  ;;  %v2567_v31 = vadd.f32 %v2544_v62, %v2353_v26 }
 0x182   : > { %v2674_v33 = vadd.f32 1.0, %v3554_v27  ;;  %3567 = vpow2.f32 %v3106_v24  ;;  %v4385_v34 = vadd.f32 %v4323_v3, %v2596_v30  ;;  %v2595_v35 = vld [vmem:[#allocation2 + $0x50] sm:$0xff]  ;;  %2584 = vst.msk [vmem:[#allocation2 + $0x78] sm:$0xff] %vm207_vm2, %v2568_v25 }
 0x183   : > { %3569 = vrcp.f32 %v2675_v28  ;;  %v4389_v36 = vadd.f32 %v4323_v3, %v2595_v35  ;;  %2583 = vst.msk [vmem:[#allocation2 + $0x70] sm:$0xff] %vm207_vm2, %v2567_v31 }
 0x184   : > { %v3556_v38 = vpop.eup %3555  ;;  %3571 = vrcp.f32 %v2674_v33  ;;  %v3108_v39 = vmul.f32 -1.442695, %v4385_v34 }
 0x185   : > { %v3558_v40 = vpop.eup %3557  ;;  %v2677_v41 = vadd.f32 1.0, %v3556_v38  ;;  %3573 = vpow2.f32 %v3105_v29  ;;  %v3107_v42 = vmul.f32 -1.442695, %v4389_v36  ;;  %v2598_v43 = vld [vmem:[#allocation2 + $0x68] sm:$0xff] }
 0x186   : > { %v2676_v44 = vadd.f32 1.0, %v3558_v40  ;;  %3575 = vpow2.f32 %v3108_v39  ;;  %v4396_v45 = vadd.f32 %v4323_v3, %v2598_v43  ;;  %v2597_v46 = vld [vmem:[#allocation2 + $0x60] sm:$0xff] }
 0x187   : > { %3577 = vrcp.f32 %v2677_v41  ;;  %v4399_v47 = vadd.f32 %v4323_v3, %v2597_v46 }
 0x188   : > { %v3560_v48 = vpop.eup %3559  ;;  %3579 = vrcp.f32 %v2676_v44  ;;  %v3110_v49 = vmul.f32 -1.442695, %v4396_v45 }
 0x189   : > { %v3562_v51 = vpop.eup %3561  ;;  %v2679_v52 = vadd.f32 1.0, %v3560_v48  ;;  %3581 = vpow2.f32 %v3107_v42  ;;  %v3109_v53 = vmul.f32 -1.442695, %v4399_v47  ;;  %v2600_v54 = vld [vmem:[#allocation2 + $0x78] sm:$0xff] }
 0x18a   : > { %v3564_v56 = vpop.eup %3563  ;;  %v2721_v57 = vmul.f32 %v3562_v51, %v4329_v14  ;;  %3583 = vpow2.f32 %v3110_v49  ;;  %v4410_v58 = vadd.f32 %v4323_v3, %v2600_v54  ;;  %v2599_v59 = vld [vmem:[#allocation2 + $0x70] sm:$0xff] }
 0x18b   : > { %v3566_v60 = vpop.eup %3565  ;;  %v2720_v61 = vmul.f32 %v3564_v56, %v4333_v19  ;;  %3585 = vrcp.f32 %v2679_v52  ;;  %v4414_v62 = vadd.f32 %v4323_v3, %v2599_v59 }
 0x18c   : > { %v3568_v63 = vpop.eup %3567  ;;  %2737 = vst.msk [vmem:[%s4405_s27 + $0x8] sm:$0xff] %vm207_vm2, %v2721_v57  ;;  %v2678_v0 = vadd.f32 1.0, %v3566_v60  ;;  %3587 = vpow2.f32 %v3109_v53  ;;  %v3112_v14 = vmul.f32 -1.442695, %v4410_v58 }
 0x18d   : > { %v3570_v1 = vpop.eup %3569  ;;  %2736 = vst.msk [vmem:[%s4405_s27] sm:$0xff] %vm207_vm2, %v2720_v61  ;;  %v2681_v4 = vadd.f32 1.0, %v3568_v63  ;;  %v3111_v6 = vmul.f32 -1.442695, %v4414_v62 }
 0x18e   : > { %v3572_v19 = vpop.eup %3571  ;;  %v2723_v7 = vmul.f32 %v3570_v1, %v4341_v32  ;;  %3589 = vrcp.f32 %v2678_v0 }
 0x18f   : > { %v3574_v3 = vpop.eup %3573  ;;  %v2722_v8 = vmul.f32 %v3572_v19, %v4345_v37  ;;  %3591 = vrcp.f32 %v2681_v4 }
 0x190   : > { %v3576_v9 = vpop.eup %3575  ;;  %2739 = vst.msk [vmem:[%s4405_s27 + $0x18] sm:$0xff] %vm207_vm2, %v2723_v7  ;;  %v2680_v10 = vadd.f32 1.0, %v3574_v3  ;;  %3593 = vpow2.f32 %v3112_v14 }
 0x191   : > { %v3578_v11 = vpop.eup %3577  ;;  %2738 = vst.msk [vmem:[%s4405_s27 + $0x10] sm:$0xff] %vm207_vm2, %v2722_v8  ;;  %v2683_v12 = vadd.f32 1.0, %v3576_v9  ;;  %3595 = vpow2.f32 %v3111_v6 }
 0x192   : > { %v3580_v13 = vpop.eup %3579  ;;  %v2725_v32 = vmul.f32 %v3578_v11, %v4353_v50  ;;  %3597 = vrcp.f32 %v2680_v10 }
 0x193   : > { %v3582_v15 = vpop.eup %3581  ;;  %v2724_v37 = vmul.f32 %v3580_v13, %v4357_v55  ;;  %3599 = vrcp.f32 %v2683_v12 }
 0x194   : > { %v3584_v16 = vpop.eup %3583  ;;  %2741 = vst.msk [vmem:[%s4405_s27 + $0x28] sm:$0xff] %vm207_vm2, %v2725_v32  ;;  %v2682_v17 = vadd.f32 1.0, %v3582_v15 }
 0x195   : > { %v3586_v20 = vpop.eup %3585  ;;  %2740 = vst.msk [vmem:[%s4405_s27 + $0x20] sm:$0xff] %vm207_vm2, %v2724_v37  ;;  %v2685_v22 = vadd.f32 1.0, %v3584_v16 }
 0x196   : > { %v3588_v23 = vpop.eup %3587  ;;  %v2727_v24 = vmul.f32 %v3586_v20, %v4365_v2  ;;  %3601 = vrcp.f32 %v2682_v17 }
 0x197   : > { %3603 = vrcp.f32 %v2685_v22  ;;  %v2684_v50 = vadd.f32 1.0, %v3588_v23 }
 0x198   : > { %v3590_v25 = vpop.eup %3589  ;;  %2743 = vst.msk [vmem:[%s4405_s27 + $0x38] sm:$0xff] %vm207_vm2, %v2727_v24 }
 0x199   : > { %v3592_v55 = vpop.eup %3591  ;;  %v2726_v26 = vmul.f32 %v3590_v25, %v4369_v5  ;;  %3605 = vrcp.f32 %v2684_v50 }
 0x19a   : > { %v3594_v27 = vpop.eup %3593  ;;  %v2729_v28 = vmul.f32 %v3592_v55, %v4375_v18 }
 0x19b   : > { %v3596_v29 = vpop.eup %3595  ;;  %2742 = vst.msk [vmem:[%s4405_s27 + $0x30] sm:$0xff] %vm207_vm2, %v2726_v26  ;;  %v2687_v30 = vadd.f32 1.0, %v3594_v27 }
 0x19c   : > { %v3598_v2 = vpop.eup %3597  ;;  %2745 = vst.msk [vmem:[%s4405_s27 + $0x48] sm:$0xff] %vm207_vm2, %v2729_v28  ;;  %v2686_v31 = vadd.f32 1.0, %v3596_v29 }
 0x19d   : > { %v3600_v33 = vpop.eup %3599  ;;  %v2728_v35 = vmul.f32 %v3598_v2, %v4379_v21  ;;  %3607 = vrcp.f32 %v2687_v30 }
 0x19e   : > { %v2731_v5 = vmul.f32 %v3600_v33, %v4385_v34  ;;  %3609 = vrcp.f32 %v2686_v31 }
 0x19f   : > { %2744 = vst.msk [vmem:[%s4405_s27 + $0x40] sm:$0xff] %vm207_vm2, %v2728_v35 }
 0x1a0   : > { %v3602_v18 = vpop.eup %3601  ;;  %2747 = vst.msk [vmem:[%s4405_s27 + $0x58] sm:$0xff] %vm207_vm2, %v2731_v5 }
 0x1a1   : > { %v3604_v38 = vpop.eup %3603  ;;  %v2730_v39 = vmul.f32 %v3602_v18, %v4389_v36 }
 0x1a2   : > { %v2733_v40 = vmul.f32 %v3604_v38, %v4396_v45 }
 0x1a3   : > { %v3606_v41 = vpop.eup %3605  ;;  %2746 = vst.msk [vmem:[%s4405_s27 + $0x50] sm:$0xff] %vm207_vm2, %v2730_v39 }
 0x1a4   : > { %2749 = vst.msk [vmem:[%s4405_s27 + $0x68] sm:$0xff] %vm207_vm2, %v2733_v40  ;;  %v2732_v21 = vmul.f32 %v3606_v41, %v4399_v47 }
 0x1a6   : > { %2748 = vst.msk [vmem:[%s4405_s27 + $0x60] sm:$0xff] %vm207_vm2, %v2732_v21 }
 0x1a7   : > { %v3608_v34 = vpop.eup %3607 }
 0x1a8   : > { %v3610_v42 = vpop.eup %3609  ;;  %v2735_v43 = vmul.f32 %v3608_v34, %v4410_v58 }
 0x1a9   : > { %v2734_v44 = vmul.f32 %v3610_v42, %v4414_v62 }
 0x1aa   : > { %2751 = vst.msk [vmem:[%s4405_s27 + $0x78] sm:$0xff] %vm207_vm2, %v2735_v43 }
 0x1ab   : > { %2750 = vst.msk [vmem:[%s4405_s27 + $0x70] sm:$0xff] %vm207_vm2, %v2734_v44 }
 0x1ac PF: > { %s13_s16 = sadd.s32 1, %s3649_s16   ;;  %s4483_s12 = smov %s3641_s14 }
 0x1ad   : > { %p10_p6 = scmp.ge.s32.totalorder %s13_s16, 6   ;;  %s4484_s13 = smov %s3645_s15 }
 0x1ae   : > { %s4485_s14 = smov %s4488_s17  ;;  %s4486_s15 = smov %s4492_s18 }
 0x1af   :  { %12 = sbr.rel (!%p10_p6) target bundleno = 3 (0x3), region = 72 }

</bundles_post_ra>
